<compile_context>
chip_gen: v6e
topology: v6e:2x2x1
jax: 0.10.0
libtpu: 0.0.40
codegen_flags: <defaults>
</compile_context>

<pallas_src>
import jax
import jax.numpy as jnp
from jax.experimental import pallas as pl
from jax.experimental.pallas import tpu as pltpu

EPS = 1e-5            # PyTorch BatchNorm2d default eps
CNGF = 64             # the module hard-codes cngf = 64
C_PAD = 128           # lane-padded channel count (full 128-lane vregs)

# For ConvTranspose2d(k=4, s=2, p=1): output index y = 2*i - 1 + ky.
#   parity 0 (y = 2v):   contributing input rows i = v-1 (ky=3), i = v   (ky=1)
#   parity 1 (y = 2v+1): contributing input rows i = v   (ky=2), i = v+1 (ky=0)
PHASE_OFFSETS = ((-1, 0), (0, 1))
PHASE_KTAPS = ((3, 1), (2, 0))


# ----------------------------- fused Pallas kernel ---------------------------

def _make_fused_kernel(B, S, f, n_bn):
    """Builds the fused forward kernel, specialised to the static shapes."""
    CP = C_PAD
    npos = 16                      # initial 4x4 spatial positions
    M = B * S * S                  # flattened output rows per phase
    inv_n = 1.0 / float(B * npos)

    def kernel(x_ref, w1_ref, gam_ref, bet_ref, w2_ref, o_ref, h2p_sc, a_sc):
        # (1) initial ConvTranspose2d(nz, 64, 4, 1, 0) as ONE block-diag matmul
        #     (16*B, 16*nz) x (16*nz, CP) -> (16*B, CP); row p*B + b holds the
        #     activation of batch b at 4x4 position p = ky*4 + kx.
        h = jnp.dot(x_ref[...], w1_ref[...], preferred_element_type=jnp.float32)

        # (2) BatchNorm2d (training batch stats, biased var) + ReLU chain with
        #     fused statistics.  Nearest upsample duplicates values, so the
        #     per-channel stats of every pyramid level equal the 4x4 stats and
        #     the whole BN/ReLU chain is evaluated at 4x4 resolution (exact).
        for s_idx in range(n_bn):
            ssum = jnp.sum(h, axis=0, keepdims=True)            # (1, CP)
            ssq = jnp.sum(h * h, axis=0, keepdims=True)          # (1, CP)
            mean = ssum * inv_n
            var = ssq * inv_n - mean * mean                      # biased var
            scale = jax.lax.rsqrt(var + EPS) * gam_ref[s_idx]
            shift = bet_ref[s_idx] - mean * scale
            h = jnp.maximum(h * scale + shift, 0.0)

        # (3) nearest upsample (4x4 -> SxS) into a zero-padded VMEM buffer; the
        #     1-pixel border is the stride-2 deconv's padding.  One broadcast
        #     block store per 4x4 position (lane-dense, 128 wide).
        h2p_sc[...] = jnp.zeros_like(h2p_sc)
        for p in range(npos):
            v4, u4 = p // 4, p % 4
            z = h[p * B:(p + 1) * B, :]                          # (B, CP)
            zb = jnp.broadcast_to(z[:, None, None, :], (B, f, f, CP))
            h2p_sc[:, 1 + f * v4:1 + f * (v4 + 1),
                   1 + f * u4:1 + f * (u4 + 1), :] = zb

        # (4) im2col for the phase-decomposed final deconv: the 9 DISTINCT
        #     (dy, dx) windows, each extracted once and written to its own
        #     128-aligned lane block (unmasked stores, no per-slab casts).
        for dyi in range(3):
            for dxi in range(3):
                col = (dyi * 3 + dxi) * CP
                slab = h2p_sc[:, dyi:dyi + S, dxi:dxi + S, :]    # (B,S,S,CP)
                a_sc[:, col:col + CP] = slab.reshape(M, CP)

        # (5) final ConvTranspose2d(64, nc, 4, 2, 1) + Sigmoid: all 4 output
        #     phases and all 16 taps evaluated by ONE MXU contraction against
        #     the fused (4*NC_PAD, 9*CP) weight, one sigmoid pass and one
        #     lane-dense (4*NC_PAD, M) store.
        out = jax.lax.dot_general(
            w2_ref[...], a_sc[...],
            dimension_numbers=(((1,), (1,)), ((), ())),
            preferred_element_type=jnp.float32)                  # (4*NC_PAD, M)
        o_ref[...] = jax.nn.sigmoid(out)

    return kernel


# ----------------------------- weight preprocessing --------------------------

def _prep_weights(params, nz, nc, nc_pad):
    C, CP = CNGF, C_PAD

    # initial deconv block weight: row q*nz + z (q = ky*4 + kx), lane-padded.
    w1_bd = jnp.transpose(params["w1"], (2, 3, 0, 1)).reshape(16 * nz, C)
    w1_bd = jnp.pad(w1_bd.astype(jnp.float32), ((0, 0), (0, CP - C)))

    # fused final deconv weight: row phase*nc_pad + n (phase = py*2 + px),
    # column slab*CP + c with slab = (dy+1)*3 + (dx+1).  Slabs not belonging
    # to a phase get zero blocks (free on the MXU, avoids any accumulation).
    w2 = params["w2"].astype(jnp.float32)                        # (C, nc, 4, 4)
    phase_rows = []
    for py in range(2):
        for px in range(2):
            cols = []
            for dy in (-1, 0, 1):
                for dx in (-1, 0, 1):
                    if dy in PHASE_OFFSETS[py] and dx in PHASE_OFFSETS[px]:
                        ky = PHASE_KTAPS[py][PHASE_OFFSETS[py].index(dy)]
                        kx = PHASE_KTAPS[px][PHASE_OFFSETS[px].index(dx)]
                        blk = jnp.transpose(w2[:, :, ky, kx], (1, 0))   # (nc, C)
                        blk = jnp.pad(blk, ((0, nc_pad - nc), (0, CP - C)))
                    else:
                        blk = jnp.zeros((nc_pad, CP), jnp.float32)
                    cols.append(blk)
            phase_rows.append(jnp.concatenate(cols, axis=1))     # (nc_pad, 9*CP)
    w2_fused = jnp.concatenate(phase_rows, axis=0)               # (4*nc_pad, 9*CP)
    return w1_bd, w2_fused


# ----------------------------- forward ----------------------------------------

def dcgan_gu_forward(params, x, isize):
    """x: (B, nz, 1, 1) NCHW  ->  (B, nc, isize, isize) NCHW, one fused kernel."""
    C, CP = CNGF, C_PAD
    B, nz = x.shape[0], x.shape[1]
    nc = params["w2"].shape[1]
    nc_pad = ((nc + 7) // 8) * 8
    S = isize // 2                 # spatial size fed to the final deconv
    f = S // 4                     # total nearest-upsample factor (4x4 -> SxS)
    levels, csize = 0, 4
    while csize < isize // 2:      # mirrors the module's pyramid loop
        csize *= 2
        levels += 1
    n_bn = 1 + levels
    M = B * S * S

    x2d = x.reshape(B, nz).astype(jnp.float32)
    # block-diagonal latent: x_bd[p*B + b, q*nz + z] = x[b, z] * (p == q)
    x_bd = jnp.kron(jnp.eye(16, dtype=jnp.float32), x2d)        # (16*B, 16*nz)
    w1_bd, w2_fused = _prep_weights(params, nz, nc, nc_pad)
    gammas = jnp.stack([jnp.pad(params[f"bn{i}_gamma"].astype(jnp.float32),
                                (0, CP - C)).reshape(1, CP) for i in range(n_bn)])
    betas = jnp.stack([jnp.pad(params[f"bn{i}_beta"].astype(jnp.float32),
                               (0, CP - C)).reshape(1, CP) for i in range(n_bn)])

    kernel = _make_fused_kernel(B, S, f, n_bn)
    o_t = pl.pallas_call(
        kernel,
        out_shape=jax.ShapeDtypeStruct((4 * nc_pad, M), jnp.float32),
        grid=(1,),
        in_specs=[
            pl.BlockSpec((16 * B, 16 * nz), lambda i: (0, 0)),
            pl.BlockSpec((16 * nz, CP), lambda i: (0, 0)),
            pl.BlockSpec((n_bn, 1, CP), lambda i: (0, 0, 0)),
            pl.BlockSpec((n_bn, 1, CP), lambda i: (0, 0, 0)),
            pl.BlockSpec((4 * nc_pad, 9 * CP), lambda i: (0, 0)),
        ],
        out_specs=pl.BlockSpec((4 * nc_pad, M), lambda i: (0, 0)),
        scratch_shapes=[
            pltpu.VMEM((B, S + 2, S + 2, CP), jnp.float32),   # padded upsampled act
            pltpu.VMEM((M, 9 * CP), jnp.float32),             # 9-slab im2col
        ],
        compiler_params=pltpu.CompilerParams(
            dimension_semantics=("arbitrary",)),
    )(x_bd, w1_bd, gammas, betas, w2_fused)

    # wrapper-side layout plumbing: row (py*2+px)*nc_pad + n, col b*S*S + v*S + u
    o = o_t.reshape(2, 2, nc_pad, B, S, S)[:, :, :nc]            # (py,px,n,b,v,u)
    o = jnp.transpose(o, (3, 2, 4, 0, 5, 1))                     # (b,n,v,py,u,px)
    return o.reshape(B, nc, isize, isize)


# ----------------------------- pure-JAX reference -----------------------------

def _reference_forward(params, x, isize):
    """Straightforward XLA reference of the PyTorch module (for validation)."""
    B, nz = x.shape[0], x.shape[1]
    C = CNGF

    def bn_relu(h, g, b):
        mean = h.mean(axis=(0, 2, 3), keepdims=True)
        var = ((h - mean) ** 2).mean(axis=(0, 2, 3), keepdims=True)
        y = (h - mean) * jax.lax.rsqrt(var + EPS)
        y = y * g.reshape(1, C, 1, 1) + b.reshape(1, C, 1, 1)
        return jnp.maximum(y, 0.0)

    h = jnp.einsum("bz,zcyx->bcyx", x.reshape(B, nz), params["w1"])
    h = bn_relu(h, params["bn0_gamma"], params["bn0_beta"])
    csize, idx = 4, 0
    while csize < isize // 2:
        h = jnp.repeat(jnp.repeat(h, 2, axis=2), 2, axis=3)
        csize *= 2
        idx += 1
        h = bn_relu(h, params[f"bn{idx}_gamma"], params[f"bn{idx}_beta"])
    wf = jnp.transpose(jnp.flip(params["w2"], (2, 3)), (1, 0, 2, 3))  # (nc,C,4,4)
    out = jax.lax.conv_general_dilated(
        h, wf, window_strides=(1, 1), padding=((2, 2), (2, 2)),
        lhs_dilation=(2, 2), dimension_numbers=("NCHW", "OIHW", "NCHW"))
    return jax.nn.sigmoid(out)


# ----------------------------- params -----------------------------------------

def init_params(key, nz, nc, isize):
    cngf = CNGF
    k1, k2 = jax.random.split(key)
    params = {
        "w1": jax.random.normal(k1, (nz, cngf, 4, 4), jnp.float32) * 0.05,
        "bn0_gamma": jnp.ones((cngf,), jnp.float32),
        "bn0_beta": jnp.zeros((cngf,), jnp.float32),
        "w2": jax.random.normal(k2, (cngf, nc, 4, 4), jnp.float32) * 0.05,
    }
    csize, idx = 4, 0
    while csize < isize // 2:
        params[f"bn{idx + 1}_gamma"] = jnp.ones((cngf,), jnp.float32)
        params[f"bn{idx + 1}_beta"] = jnp.zeros((cngf,), jnp.float32)
        csize *= 2
        idx += 1
    return params


if __name__ == "__main__":
    key = jax.random.PRNGKey(0)
    B, nz, nc, isize = 2, 4, 3, 16   # isize % 16 == 0 as the module asserts
    kp, kx = jax.random.split(key)
    params = init_params(kp, nz, nc, isize)
    x = jax.random.normal(kx, (B, nz, 1, 1), jnp.float32)

    fwd = jax.jit(dcgan_gu_forward, static_argnums=2)
    out = jax.block_until_ready(fwd(params, x, isize))

    assert out.shape == (B, nc, isize, isize), out.shape
    assert bool(jnp.all(jnp.isfinite(out)))
    assert bool(jnp.all((out >= 0.0) & (out <= 1.0)))      # sigmoid range

    ref = _reference_forward(params, x, isize)
    max_err = float(jnp.max(jnp.abs(out - ref)))
    assert bool(jnp.allclose(out, ref, atol=1e-3, rtol=0.0)), max_err
    print("KERNEL_OK")
</pallas_src>

<mosaic_0001>
module attributes {stable_mosaic.version = 11 : i64} {
  func.func @kernel(%arg0: i32, %arg1: memref<32x64xf32, #tpu.memory_space<vmem>>, %arg2: memref<64x128xf32, #tpu.memory_space<vmem>>, %arg3: memref<2x1x128xf32, #tpu.memory_space<vmem>>, %arg4: memref<2x1x128xf32, #tpu.memory_space<vmem>>, %arg5: memref<32x1152xf32, #tpu.memory_space<vmem>>, %arg6: memref<32x128xf32, #tpu.memory_space<vmem>>, %arg7: memref<2x10x10x128xf32, #tpu.memory_space<vmem>>, %arg8: memref<128x1152xf32, #tpu.memory_space<vmem>>) attributes {dimension_semantics = [#tpu.dimension_semantics<arbitrary>], iteration_bounds = array<i64: 1>, scalar_prefetch = 0 : i64, scratch_operands = 2 : i64, tpu.core_type = #tpu.core_type<tc>, window_params = [{pipeline_mode = #tpu.pipeline_mode<synchronous>, transform_indices = @transform_0, window_bounds = array<i64: 32, 64>}, {pipeline_mode = #tpu.pipeline_mode<synchronous>, transform_indices = @transform_1, window_bounds = array<i64: 64, 128>}, {pipeline_mode = #tpu.pipeline_mode<synchronous>, transform_indices = @transform_2, window_bounds = array<i64: 2, 1, 128>}, {pipeline_mode = #tpu.pipeline_mode<synchronous>, transform_indices = @transform_3, window_bounds = array<i64: 2, 1, 128>}, {pipeline_mode = #tpu.pipeline_mode<synchronous>, transform_indices = @transform_4, window_bounds = array<i64: 32, 1152>}, {pipeline_mode = #tpu.pipeline_mode<synchronous>, transform_indices = @transform_5, window_bounds = array<i64: 32, 128>}]} {
    %c0 = arith.constant 0 : index
    %c0_0 = arith.constant 0 : index
    %0 = vector.load %arg1[%c0, %c0_0] : memref<32x64xf32, #tpu.memory_space<vmem>>, vector<32x64xf32>
    %c0_1 = arith.constant 0 : index
    %c0_2 = arith.constant 0 : index
    %1 = vector.load %arg2[%c0_1, %c0_2] : memref<64x128xf32, #tpu.memory_space<vmem>>, vector<64x128xf32>
    %cst = arith.constant dense<0.000000e+00> : vector<32x128xf32>
    %2 = tpu.matmul %0, %1, %cst {dimension_numbers = #tpu.dot_dimension_numbers<[1], [0], [0], [1], [0, 0, 1, 1], [], []>} : vector<32x64xf32>, vector<64x128xf32>, vector<32x128xf32> -> vector<32x128xf32>
    %cst_3 = arith.constant dense<0.000000e+00> : vector<128xf32>
    %3 = vector.multi_reduction <add>, %2, %cst_3 [0] : vector<32x128xf32> to vector<128xf32>
    %4 = vector.shape_cast %3 : vector<128xf32> to vector<1x128xf32>
    %5 = arith.mulf %2, %2 : vector<32x128xf32>
    %cst_4 = arith.constant dense<0.000000e+00> : vector<128xf32>
    %6 = vector.multi_reduction <add>, %5, %cst_4 [0] : vector<32x128xf32> to vector<128xf32>
    %7 = vector.shape_cast %6 : vector<128xf32> to vector<1x128xf32>
    %cst_5 = arith.constant 3.125000e-02 : f32
    %8 = vector.broadcast %cst_5 : f32 to vector<1x128xf32>
    %9 = arith.mulf %4, %8 : vector<1x128xf32>
    %cst_6 = arith.constant 3.125000e-02 : f32
    %10 = vector.broadcast %cst_6 : f32 to vector<1x128xf32>
    %11 = arith.mulf %7, %10 : vector<1x128xf32>
    %12 = arith.mulf %9, %9 : vector<1x128xf32>
    %13 = arith.subf %11, %12 : vector<1x128xf32>
    %cst_7 = arith.constant 9.99999974E-6 : f32
    %14 = vector.broadcast %cst_7 : f32 to vector<1x128xf32>
    %15 = arith.addf %13, %14 : vector<1x128xf32>
    %16 = math.rsqrt %15 : vector<1x128xf32>
    %c0_8 = arith.constant 0 : index
    %c0_9 = arith.constant 0 : index
    %c0_10 = arith.constant 0 : index
    %17 = vector.load %arg3[%c0_8, %c0_9, %c0_10] : memref<2x1x128xf32, #tpu.memory_space<vmem>>, vector<1x1x128xf32>
    %18 = vector.shape_cast %17 : vector<1x1x128xf32> to vector<1x128xf32>
    %19 = arith.mulf %16, %18 : vector<1x128xf32>
    %c0_11 = arith.constant 0 : index
    %c0_12 = arith.constant 0 : index
    %c0_13 = arith.constant 0 : index
    %20 = vector.load %arg4[%c0_11, %c0_12, %c0_13] : memref<2x1x128xf32, #tpu.memory_space<vmem>>, vector<1x1x128xf32>
    %21 = vector.shape_cast %20 : vector<1x1x128xf32> to vector<1x128xf32>
    %22 = arith.mulf %9, %19 : vector<1x128xf32>
    %23 = arith.subf %21, %22 : vector<1x128xf32>
    %24 = vector.broadcast %19 : vector<1x128xf32> to vector<32x128xf32>
    %25 = arith.mulf %2, %24 : vector<32x128xf32>
    %26 = vector.broadcast %23 : vector<1x128xf32> to vector<32x128xf32>
    %27 = arith.addf %25, %26 : vector<32x128xf32>
    %cst_14 = arith.constant 0.000000e+00 : f32
    %28 = vector.broadcast %cst_14 : f32 to vector<32x128xf32>
    %29 = arith.maximumf %27, %28 : vector<32x128xf32>
    %cst_15 = arith.constant dense<0.000000e+00> : vector<128xf32>
    %30 = vector.multi_reduction <add>, %29, %cst_15 [0] : vector<32x128xf32> to vector<128xf32>
    %31 = vector.shape_cast %30 : vector<128xf32> to vector<1x128xf32>
    %32 = arith.mulf %29, %29 : vector<32x128xf32>
    %cst_16 = arith.constant dense<0.000000e+00> : vector<128xf32>
    %33 = vector.multi_reduction <add>, %32, %cst_16 [0] : vector<32x128xf32> to vector<128xf32>
    %34 = vector.shape_cast %33 : vector<128xf32> to vector<1x128xf32>
    %cst_17 = arith.constant 3.125000e-02 : f32
    %35 = vector.broadcast %cst_17 : f32 to vector<1x128xf32>
    %36 = arith.mulf %31, %35 : vector<1x128xf32>
    %cst_18 = arith.constant 3.125000e-02 : f32
    %37 = vector.broadcast %cst_18 : f32 to vector<1x128xf32>
    %38 = arith.mulf %34, %37 : vector<1x128xf32>
    %39 = arith.mulf %36, %36 : vector<1x128xf32>
    %40 = arith.subf %38, %39 : vector<1x128xf32>
    %cst_19 = arith.constant 9.99999974E-6 : f32
    %41 = vector.broadcast %cst_19 : f32 to vector<1x128xf32>
    %42 = arith.addf %40, %41 : vector<1x128xf32>
    %43 = math.rsqrt %42 : vector<1x128xf32>
    %c1 = arith.constant 1 : index
    %c0_20 = arith.constant 0 : index
    %c0_21 = arith.constant 0 : index
    %44 = vector.load %arg3[%c1, %c0_20, %c0_21] : memref<2x1x128xf32, #tpu.memory_space<vmem>>, vector<1x1x128xf32>
    %45 = vector.shape_cast %44 : vector<1x1x128xf32> to vector<1x128xf32>
    %46 = arith.mulf %43, %45 : vector<1x128xf32>
    %c1_22 = arith.constant 1 : index
    %c0_23 = arith.constant 0 : index
    %c0_24 = arith.constant 0 : index
    %47 = vector.load %arg4[%c1_22, %c0_23, %c0_24] : memref<2x1x128xf32, #tpu.memory_space<vmem>>, vector<1x1x128xf32>
    %48 = vector.shape_cast %47 : vector<1x1x128xf32> to vector<1x128xf32>
    %49 = arith.mulf %36, %46 : vector<1x128xf32>
    %50 = arith.subf %48, %49 : vector<1x128xf32>
    %51 = vector.broadcast %46 : vector<1x128xf32> to vector<32x128xf32>
    %52 = arith.mulf %29, %51 : vector<32x128xf32>
    %53 = vector.broadcast %50 : vector<1x128xf32> to vector<32x128xf32>
    %54 = arith.addf %52, %53 : vector<32x128xf32>
    %cst_25 = arith.constant 0.000000e+00 : f32
    %55 = vector.broadcast %cst_25 : f32 to vector<32x128xf32>
    %56 = arith.maximumf %54, %55 : vector<32x128xf32>
    %cst_26 = arith.constant 0.000000e+00 : f32
    %57 = vector.broadcast %cst_26 : f32 to vector<2x10x10x128xf32>
    %c0_27 = arith.constant 0 : index
    %c0_28 = arith.constant 0 : index
    %c0_29 = arith.constant 0 : index
    %c0_30 = arith.constant 0 : index
    %58 = vector.load %arg7[%c0_27, %c0_28, %c0_29, %c0_30] : memref<2x10x10x128xf32, #tpu.memory_space<vmem>>, vector<2x10x10x128xf32>
    tpu.vector_store %arg7[%c0_27, %c0_28, %c0_29, %c0_30], %57 {strides = array<i32>} : memref<2x10x10x128xf32, #tpu.memory_space<vmem>>, vector<2x10x10x128xf32>,
    %59 = vector.extract_strided_slice %56 {offsets = [0, 0], sizes = [2, 128], strides = [1, 1]} : vector<32x128xf32> to vector<2x128xf32>
    %60 = vector.shape_cast %59 : vector<2x128xf32> to vector<2x1x1x128xf32>
    %61 = vector.shape_cast %60 : vector<2x1x1x128xf32> to vector<2x1x1x128xf32>
    %62 = vector.broadcast %61 : vector<2x1x1x128xf32> to vector<2x2x2x128xf32>
    %c0_31 = arith.constant 0 : index
    %c1_32 = arith.constant 1 : index
    %c1_33 = arith.constant 1 : index
    %c0_34 = arith.constant 0 : index
    %63 = vector.load %arg7[%c0_31, %c1_32, %c1_33, %c0_34] : memref<2x10x10x128xf32, #tpu.memory_space<vmem>>, vector<2x2x2x128xf32>
    tpu.vector_store %arg7[%c0_31, %c1_32, %c1_33, %c0_34], %62 {strides = array<i32>} : memref<2x10x10x128xf32, #tpu.memory_space<vmem>>, vector<2x2x2x128xf32>,
    %64 = vector.extract_strided_slice %56 {offsets = [2, 0], sizes = [2, 128], strides = [1, 1]} : vector<32x128xf32> to vector<2x128xf32>
    %65 = vector.shape_cast %64 : vector<2x128xf32> to vector<2x1x1x128xf32>
    %66 = vector.shape_cast %65 : vector<2x1x1x128xf32> to vector<2x1x1x128xf32>
    %67 = vector.broadcast %66 : vector<2x1x1x128xf32> to vector<2x2x2x128xf32>
    %c0_35 = arith.constant 0 : index
    %c1_36 = arith.constant 1 : index
    %c3 = arith.constant 3 : index
    %c0_37 = arith.constant 0 : index
    %68 = vector.load %arg7[%c0_35, %c1_36, %c3, %c0_37] : memref<2x10x10x128xf32, #tpu.memory_space<vmem>>, vector<2x2x2x128xf32>
    tpu.vector_store %arg7[%c0_35, %c1_36, %c3, %c0_37], %67 {strides = array<i32>} : memref<2x10x10x128xf32, #tpu.memory_space<vmem>>, vector<2x2x2x128xf32>,
    %69 = vector.extract_strided_slice %56 {offsets = [4, 0], sizes = [2, 128], strides = [1, 1]} : vector<32x128xf32> to vector<2x128xf32>
    %70 = vector.shape_cast %69 : vector<2x128xf32> to vector<2x1x1x128xf32>
    %71 = vector.shape_cast %70 : vector<2x1x1x128xf32> to vector<2x1x1x128xf32>
    %72 = vector.broadcast %71 : vector<2x1x1x128xf32> to vector<2x2x2x128xf32>
    %c0_38 = arith.constant 0 : index
    %c1_39 = arith.constant 1 : index
    %c5 = arith.constant 5 : index
    %c0_40 = arith.constant 0 : index
    %73 = vector.load %arg7[%c0_38, %c1_39, %c5, %c0_40] : memref<2x10x10x128xf32, #tpu.memory_space<vmem>>, vector<2x2x2x128xf32>
    tpu.vector_store %arg7[%c0_38, %c1_39, %c5, %c0_40], %72 {strides = array<i32>} : memref<2x10x10x128xf32, #tpu.memory_space<vmem>>, vector<2x2x2x128xf32>,
    %74 = vector.extract_strided_slice %56 {offsets = [6, 0], sizes = [2, 128], strides = [1, 1]} : vector<32x128xf32> to vector<2x128xf32>
    %75 = vector.shape_cast %74 : vector<2x128xf32> to vector<2x1x1x128xf32>
    %76 = vector.shape_cast %75 : vector<2x1x1x128xf32> to vector<2x1x1x128xf32>
    %77 = vector.broadcast %76 : vector<2x1x1x128xf32> to vector<2x2x2x128xf32>
    %c0_41 = arith.constant 0 : index
    %c1_42 = arith.constant 1 : index
    %c7 = arith.constant 7 : index
    %c0_43 = arith.constant 0 : index
    %78 = vector.load %arg7[%c0_41, %c1_42, %c7, %c0_43] : memref<2x10x10x128xf32, #tpu.memory_space<vmem>>, vector<2x2x2x128xf32>
    tpu.vector_store %arg7[%c0_41, %c1_42, %c7, %c0_43], %77 {strides = array<i32>} : memref<2x10x10x128xf32, #tpu.memory_space<vmem>>, vector<2x2x2x128xf32>,
    %79 = vector.extract_strided_slice %56 {offsets = [8, 0], sizes = [2, 128], strides = [1, 1]} : vector<32x128xf32> to vector<2x128xf32>
    %80 = vector.shape_cast %79 : vector<2x128xf32> to vector<2x1x1x128xf32>
    %81 = vector.shape_cast %80 : vector<2x1x1x128xf32> to vector<2x1x1x128xf32>
    %82 = vector.broadcast %81 : vector<2x1x1x128xf32> to vector<2x2x2x128xf32>
    %c0_44 = arith.constant 0 : index
    %c3_45 = arith.constant 3 : index
    %c1_46 = arith.constant 1 : index
    %c0_47 = arith.constant 0 : index
    %83 = vector.load %arg7[%c0_44, %c3_45, %c1_46, %c0_47] : memref<2x10x10x128xf32, #tpu.memory_space<vmem>>, vector<2x2x2x128xf32>
    tpu.vector_store %arg7[%c0_44, %c3_45, %c1_46, %c0_47], %82 {strides = array<i32>} : memref<2x10x10x128xf32, #tpu.memory_space<vmem>>, vector<2x2x2x128xf32>,
    %84 = vector.extract_strided_slice %56 {offsets = [10, 0], sizes = [2, 128], strides = [1, 1]} : vector<32x128xf32> to vector<2x128xf32>
    %85 = vector.shape_cast %84 : vector<2x128xf32> to vector<2x1x1x128xf32>
    %86 = vector.shape_cast %85 : vector<2x1x1x128xf32> to vector<2x1x1x128xf32>
    %87 = vector.broadcast %86 : vector<2x1x1x128xf32> to vector<2x2x2x128xf32>
    %c0_48 = arith.constant 0 : index
    %c3_49 = arith.constant 3 : index
    %c3_50 = arith.constant 3 : index
    %c0_51 = arith.constant 0 : index
    %88 = vector.load %arg7[%c0_48, %c3_49, %c3_50, %c0_51] : memref<2x10x10x128xf32, #tpu.memory_space<vmem>>, vector<2x2x2x128xf32>
    tpu.vector_store %arg7[%c0_48, %c3_49, %c3_50, %c0_51], %87 {strides = array<i32>} : memref<2x10x10x128xf32, #tpu.memory_space<vmem>>, vector<2x2x2x128xf32>,
    %89 = vector.extract_strided_slice %56 {offsets = [12, 0], sizes = [2, 128], strides = [1, 1]} : vector<32x128xf32> to vector<2x128xf32>
    %90 = vector.shape_cast %89 : vector<2x128xf32> to vector<2x1x1x128xf32>
    %91 = vector.shape_cast %90 : vector<2x1x1x128xf32> to vector<2x1x1x128xf32>
    %92 = vector.broadcast %91 : vector<2x1x1x128xf32> to vector<2x2x2x128xf32>
    %c0_52 = arith.constant 0 : index
    %c3_53 = arith.constant 3 : index
    %c5_54 = arith.constant 5 : index
    %c0_55 = arith.constant 0 : index
    %93 = vector.load %arg7[%c0_52, %c3_53, %c5_54, %c0_55] : memref<2x10x10x128xf32, #tpu.memory_space<vmem>>, vector<2x2x2x128xf32>
    tpu.vector_store %arg7[%c0_52, %c3_53, %c5_54, %c0_55], %92 {strides = array<i32>} : memref<2x10x10x128xf32, #tpu.memory_space<vmem>>, vector<2x2x2x128xf32>,
    %94 = vector.extract_strided_slice %56 {offsets = [14, 0], sizes = [2, 128], strides = [1, 1]} : vector<32x128xf32> to vector<2x128xf32>
    %95 = vector.shape_cast %94 : vector<2x128xf32> to vector<2x1x1x128xf32>
    %96 = vector.shape_cast %95 : vector<2x1x1x128xf32> to vector<2x1x1x128xf32>
    %97 = vector.broadcast %96 : vector<2x1x1x128xf32> to vector<2x2x2x128xf32>
    %c0_56 = arith.constant 0 : index
    %c3_57 = arith.constant 3 : index
    %c7_58 = arith.constant 7 : index
    %c0_59 = arith.constant 0 : index
    %98 = vector.load %arg7[%c0_56, %c3_57, %c7_58, %c0_59] : memref<2x10x10x128xf32, #tpu.memory_space<vmem>>, vector<2x2x2x128xf32>
    tpu.vector_store %arg7[%c0_56, %c3_57, %c7_58, %c0_59], %97 {strides = array<i32>} : memref<2x10x10x128xf32, #tpu.memory_space<vmem>>, vector<2x2x2x128xf32>,
    %99 = vector.extract_strided_slice %56 {offsets = [16, 0], sizes = [2, 128], strides = [1, 1]} : vector<32x128xf32> to vector<2x128xf32>
    %100 = vector.shape_cast %99 : vector<2x128xf32> to vector<2x1x1x128xf32>
    %101 = vector.shape_cast %100 : vector<2x1x1x128xf32> to vector<2x1x1x128xf32>
    %102 = vector.broadcast %101 : vector<2x1x1x128xf32> to vector<2x2x2x128xf32>
    %c0_60 = arith.constant 0 : index
    %c5_61 = arith.constant 5 : index
    %c1_62 = arith.constant 1 : index
    %c0_63 = arith.constant 0 : index
    %103 = vector.load %arg7[%c0_60, %c5_61, %c1_62, %c0_63] : memref<2x10x10x128xf32, #tpu.memory_space<vmem>>, vector<2x2x2x128xf32>
    tpu.vector_store %arg7[%c0_60, %c5_61, %c1_62, %c0_63], %102 {strides = array<i32>} : memref<2x10x10x128xf32, #tpu.memory_space<vmem>>, vector<2x2x2x128xf32>,
    %104 = vector.extract_strided_slice %56 {offsets = [18, 0], sizes = [2, 128], strides = [1, 1]} : vector<32x128xf32> to vector<2x128xf32>
    %105 = vector.shape_cast %104 : vector<2x128xf32> to vector<2x1x1x128xf32>
    %106 = vector.shape_cast %105 : vector<2x1x1x128xf32> to vector<2x1x1x128xf32>
    %107 = vector.broadcast %106 : vector<2x1x1x128xf32> to vector<2x2x2x128xf32>
    %c0_64 = arith.constant 0 : index
    %c5_65 = arith.constant 5 : index
    %c3_66 = arith.constant 3 : index
    %c0_67 = arith.constant 0 : index
    %108 = vector.load %arg7[%c0_64, %c5_65, %c3_66, %c0_67] : memref<2x10x10x128xf32, #tpu.memory_space<vmem>>, vector<2x2x2x128xf32>
    tpu.vector_store %arg7[%c0_64, %c5_65, %c3_66, %c0_67], %107 {strides = array<i32>} : memref<2x10x10x128xf32, #tpu.memory_space<vmem>>, vector<2x2x2x128xf32>,
    %109 = vector.extract_strided_slice %56 {offsets = [20, 0], sizes = [2, 128], strides = [1, 1]} : vector<32x128xf32> to vector<2x128xf32>
    %110 = vector.shape_cast %109 : vector<2x128xf32> to vector<2x1x1x128xf32>
    %111 = vector.shape_cast %110 : vector<2x1x1x128xf32> to vector<2x1x1x128xf32>
    %112 = vector.broadcast %111 : vector<2x1x1x128xf32> to vector<2x2x2x128xf32>
    %c0_68 = arith.constant 0 : index
    %c5_69 = arith.constant 5 : index
    %c5_70 = arith.constant 5 : index
    %c0_71 = arith.constant 0 : index
    %113 = vector.load %arg7[%c0_68, %c5_69, %c5_70, %c0_71] : memref<2x10x10x128xf32, #tpu.memory_space<vmem>>, vector<2x2x2x128xf32>
    tpu.vector_store %arg7[%c0_68, %c5_69, %c5_70, %c0_71], %112 {strides = array<i32>} : memref<2x10x10x128xf32, #tpu.memory_space<vmem>>, vector<2x2x2x128xf32>,
    %114 = vector.extract_strided_slice %56 {offsets = [22, 0], sizes = [2, 128], strides = [1, 1]} : vector<32x128xf32> to vector<2x128xf32>
    %115 = vector.shape_cast %114 : vector<2x128xf32> to vector<2x1x1x128xf32>
    %116 = vector.shape_cast %115 : vector<2x1x1x128xf32> to vector<2x1x1x128xf32>
    %117 = vector.broadcast %116 : vector<2x1x1x128xf32> to vector<2x2x2x128xf32>
    %c0_72 = arith.constant 0 : index
    %c5_73 = arith.constant 5 : index
    %c7_74 = arith.constant 7 : index
    %c0_75 = arith.constant 0 : index
    %118 = vector.load %arg7[%c0_72, %c5_73, %c7_74, %c0_75] : memref<2x10x10x128xf32, #tpu.memory_space<vmem>>, vector<2x2x2x128xf32>
    tpu.vector_store %arg7[%c0_72, %c5_73, %c7_74, %c0_75], %117 {strides = array<i32>} : memref<2x10x10x128xf32, #tpu.memory_space<vmem>>, vector<2x2x2x128xf32>,
    %119 = vector.extract_strided_slice %56 {offsets = [24, 0], sizes = [2, 128], strides = [1, 1]} : vector<32x128xf32> to vector<2x128xf32>
    %120 = vector.shape_cast %119 : vector<2x128xf32> to vector<2x1x1x128xf32>
    %121 = vector.shape_cast %120 : vector<2x1x1x128xf32> to vector<2x1x1x128xf32>
    %122 = vector.broadcast %121 : vector<2x1x1x128xf32> to vector<2x2x2x128xf32>
    %c0_76 = arith.constant 0 : index
    %c7_77 = arith.constant 7 : index
    %c1_78 = arith.constant 1 : index
    %c0_79 = arith.constant 0 : index
    %123 = vector.load %arg7[%c0_76, %c7_77, %c1_78, %c0_79] : memref<2x10x10x128xf32, #tpu.memory_space<vmem>>, vector<2x2x2x128xf32>
    tpu.vector_store %arg7[%c0_76, %c7_77, %c1_78, %c0_79], %122 {strides = array<i32>} : memref<2x10x10x128xf32, #tpu.memory_space<vmem>>, vector<2x2x2x128xf32>,
    %124 = vector.extract_strided_slice %56 {offsets = [26, 0], sizes = [2, 128], strides = [1, 1]} : vector<32x128xf32> to vector<2x128xf32>
    %125 = vector.shape_cast %124 : vector<2x128xf32> to vector<2x1x1x128xf32>
    %126 = vector.shape_cast %125 : vector<2x1x1x128xf32> to vector<2x1x1x128xf32>
    %127 = vector.broadcast %126 : vector<2x1x1x128xf32> to vector<2x2x2x128xf32>
    %c0_80 = arith.constant 0 : index
    %c7_81 = arith.constant 7 : index
    %c3_82 = arith.constant 3 : index
    %c0_83 = arith.constant 0 : index
    %128 = vector.load %arg7[%c0_80, %c7_81, %c3_82, %c0_83] : memref<2x10x10x128xf32, #tpu.memory_space<vmem>>, vector<2x2x2x128xf32>
    tpu.vector_store %arg7[%c0_80, %c7_81, %c3_82, %c0_83], %127 {strides = array<i32>} : memref<2x10x10x128xf32, #tpu.memory_space<vmem>>, vector<2x2x2x128xf32>,
    %129 = vector.extract_strided_slice %56 {offsets = [28, 0], sizes = [2, 128], strides = [1, 1]} : vector<32x128xf32> to vector<2x128xf32>
    %130 = vector.shape_cast %129 : vector<2x128xf32> to vector<2x1x1x128xf32>
    %131 = vector.shape_cast %130 : vector<2x1x1x128xf32> to vector<2x1x1x128xf32>
    %132 = vector.broadcast %131 : vector<2x1x1x128xf32> to vector<2x2x2x128xf32>
    %c0_84 = arith.constant 0 : index
    %c7_85 = arith.constant 7 : index
    %c5_86 = arith.constant 5 : index
    %c0_87 = arith.constant 0 : index
    %133 = vector.load %arg7[%c0_84, %c7_85, %c5_86, %c0_87] : memref<2x10x10x128xf32, #tpu.memory_space<vmem>>, vector<2x2x2x128xf32>
    tpu.vector_store %arg7[%c0_84, %c7_85, %c5_86, %c0_87], %132 {strides = array<i32>} : memref<2x10x10x128xf32, #tpu.memory_space<vmem>>, vector<2x2x2x128xf32>,
    %134 = vector.extract_strided_slice %56 {offsets = [30, 0], sizes = [2, 128], strides = [1, 1]} : vector<32x128xf32> to vector<2x128xf32>
    %135 = vector.shape_cast %134 : vector<2x128xf32> to vector<2x1x1x128xf32>
    %136 = vector.shape_cast %135 : vector<2x1x1x128xf32> to vector<2x1x1x128xf32>
    %137 = vector.broadcast %136 : vector<2x1x1x128xf32> to vector<2x2x2x128xf32>
    %c0_88 = arith.constant 0 : index
    %c7_89 = arith.constant 7 : index
    %c7_90 = arith.constant 7 : index
    %c0_91 = arith.constant 0 : index
    %138 = vector.load %arg7[%c0_88, %c7_89, %c7_90, %c0_91] : memref<2x10x10x128xf32, #tpu.memory_space<vmem>>, vector<2x2x2x128xf32>
    tpu.vector_store %arg7[%c0_88, %c7_89, %c7_90, %c0_91], %137 {strides = array<i32>} : memref<2x10x10x128xf32, #tpu.memory_space<vmem>>, vector<2x2x2x128xf32>,
    %c0_92 = arith.constant 0 : index
    %c0_93 = arith.constant 0 : index
    %c0_94 = arith.constant 0 : index
    %c0_95 = arith.constant 0 : index
    %139 = vector.load %arg7[%c0_92, %c0_93, %c0_94, %c0_95] : memref<2x10x10x128xf32, #tpu.memory_space<vmem>>, vector<2x8x8x128xf32>
    %140 = vector.shape_cast %139 : vector<2x8x8x128xf32> to vector<128x128xf32>
    %c0_96 = arith.constant 0 : index
    %c0_97 = arith.constant 0 : index
    %141 = vector.load %arg8[%c0_96, %c0_97] : memref<128x1152xf32, #tpu.memory_space<vmem>>, vector<128x128xf32>
    tpu.vector_store %arg8[%c0_96, %c0_97], %140 {strides = array<i32>} : memref<128x1152xf32, #tpu.memory_space<vmem>>, vector<128x128xf32>,
    %c0_98 = arith.constant 0 : index
    %c0_99 = arith.constant 0 : index
    %c1_100 = arith.constant 1 : index
    %c0_101 = arith.constant 0 : index
    %142 = vector.load %arg7[%c0_98, %c0_99, %c1_100, %c0_101] : memref<2x10x10x128xf32, #tpu.memory_space<vmem>>, vector<2x8x8x128xf32>
    %143 = vector.shape_cast %142 : vector<2x8x8x128xf32> to vector<128x128xf32>
    %c0_102 = arith.constant 0 : index
    %c128 = arith.constant 128 : index
    %144 = vector.load %arg8[%c0_102, %c128] : memref<128x1152xf32, #tpu.memory_space<vmem>>, vector<128x128xf32>
    tpu.vector_store %arg8[%c0_102, %c128], %143 {strides = array<i32>} : memref<128x1152xf32, #tpu.memory_space<vmem>>, vector<128x128xf32>,
    %c0_103 = arith.constant 0 : index
    %c0_104 = arith.constant 0 : index
    %c2 = arith.constant 2 : index
    %c0_105 = arith.constant 0 : index
    %145 = vector.load %arg7[%c0_103, %c0_104, %c2, %c0_105] : memref<2x10x10x128xf32, #tpu.memory_space<vmem>>, vector<2x8x8x128xf32>
    %146 = vector.shape_cast %145 : vector<2x8x8x128xf32> to vector<128x128xf32>
    %c0_106 = arith.constant 0 : index
    %c256 = arith.constant 256 : index
    %147 = vector.load %arg8[%c0_106, %c256] : memref<128x1152xf32, #tpu.memory_space<vmem>>, vector<128x128xf32>
    tpu.vector_store %arg8[%c0_106, %c256], %146 {strides = array<i32>} : memref<128x1152xf32, #tpu.memory_space<vmem>>, vector<128x128xf32>,
    %c0_107 = arith.constant 0 : index
    %c1_108 = arith.constant 1 : index
    %c0_109 = arith.constant 0 : index
    %c0_110 = arith.constant 0 : index
    %148 = vector.load %arg7[%c0_107, %c1_108, %c0_109, %c0_110] : memref<2x10x10x128xf32, #tpu.memory_space<vmem>>, vector<2x8x8x128xf32>
    %149 = vector.shape_cast %148 : vector<2x8x8x128xf32> to vector<128x128xf32>
    %c0_111 = arith.constant 0 : index
    %c384 = arith.constant 384 : index
    %150 = vector.load %arg8[%c0_111, %c384] : memref<128x1152xf32, #tpu.memory_space<vmem>>, vector<128x128xf32>
    tpu.vector_store %arg8[%c0_111, %c384], %149 {strides = array<i32>} : memref<128x1152xf32, #tpu.memory_space<vmem>>, vector<128x128xf32>,
    %c0_112 = arith.constant 0 : index
    %c1_113 = arith.constant 1 : index
    %c1_114 = arith.constant 1 : index
    %c0_115 = arith.constant 0 : index
    %151 = vector.load %arg7[%c0_112, %c1_113, %c1_114, %c0_115] : memref<2x10x10x128xf32, #tpu.memory_space<vmem>>, vector<2x8x8x128xf32>
    %152 = vector.shape_cast %151 : vector<2x8x8x128xf32> to vector<128x128xf32>
    %c0_116 = arith.constant 0 : index
    %c512 = arith.constant 512 : index
    %153 = vector.load %arg8[%c0_116, %c512] : memref<128x1152xf32, #tpu.memory_space<vmem>>, vector<128x128xf32>
    tpu.vector_store %arg8[%c0_116, %c512], %152 {strides = array<i32>} : memref<128x1152xf32, #tpu.memory_space<vmem>>, vector<128x128xf32>,
    %c0_117 = arith.constant 0 : index
    %c1_118 = arith.constant 1 : index
    %c2_119 = arith.constant 2 : index
    %c0_120 = arith.constant 0 : index
    %154 = vector.load %arg7[%c0_117, %c1_118, %c2_119, %c0_120] : memref<2x10x10x128xf32, #tpu.memory_space<vmem>>, vector<2x8x8x128xf32>
    %155 = vector.shape_cast %154 : vector<2x8x8x128xf32> to vector<128x128xf32>
    %c0_121 = arith.constant 0 : index
    %c640 = arith.constant 640 : index
    %156 = vector.load %arg8[%c0_121, %c640] : memref<128x1152xf32, #tpu.memory_space<vmem>>, vector<128x128xf32>
    tpu.vector_store %arg8[%c0_121, %c640], %155 {strides = array<i32>} : memref<128x1152xf32, #tpu.memory_space<vmem>>, vector<128x128xf32>,
    %c0_122 = arith.constant 0 : index
    %c2_123 = arith.constant 2 : index
    %c0_124 = arith.constant 0 : index
    %c0_125 = arith.constant 0 : index
    %157 = vector.load %arg7[%c0_122, %c2_123, %c0_124, %c0_125] : memref<2x10x10x128xf32, #tpu.memory_space<vmem>>, vector<2x8x8x128xf32>
    %158 = vector.shape_cast %157 : vector<2x8x8x128xf32> to vector<128x128xf32>
    %c0_126 = arith.constant 0 : index
    %c768 = arith.constant 768 : index
    %159 = vector.load %arg8[%c0_126, %c768] : memref<128x1152xf32, #tpu.memory_space<vmem>>, vector<128x128xf32>
    tpu.vector_store %arg8[%c0_126, %c768], %158 {strides = array<i32>} : memref<128x1152xf32, #tpu.memory_space<vmem>>, vector<128x128xf32>,
    %c0_127 = arith.constant 0 : index
    %c2_128 = arith.constant 2 : index
    %c1_129 = arith.constant 1 : index
    %c0_130 = arith.constant 0 : index
    %160 = vector.load %arg7[%c0_127, %c2_128, %c1_129, %c0_130] : memref<2x10x10x128xf32, #tpu.memory_space<vmem>>, vector<2x8x8x128xf32>
    %161 = vector.shape_cast %160 : vector<2x8x8x128xf32> to vector<128x128xf32>
    %c0_131 = arith.constant 0 : index
    %c896 = arith.constant 896 : index
    %162 = vector.load %arg8[%c0_131, %c896] : memref<128x1152xf32, #tpu.memory_space<vmem>>, vector<128x128xf32>
    tpu.vector_store %arg8[%c0_131, %c896], %161 {strides = array<i32>} : memref<128x1152xf32, #tpu.memory_space<vmem>>, vector<128x128xf32>,
    %c0_132 = arith.constant 0 : index
    %c2_133 = arith.constant 2 : index
    %c2_134 = arith.constant 2 : index
    %c0_135 = arith.constant 0 : index
    %163 = vector.load %arg7[%c0_132, %c2_133, %c2_134, %c0_135] : memref<2x10x10x128xf32, #tpu.memory_space<vmem>>, vector<2x8x8x128xf32>
    %164 = vector.shape_cast %163 : vector<2x8x8x128xf32> to vector<128x128xf32>
    %c0_136 = arith.constant 0 : index
    %c1024 = arith.constant 1024 : index
    %165 = vector.load %arg8[%c0_136, %c1024] : memref<128x1152xf32, #tpu.memory_space<vmem>>, vector<128x128xf32>
    tpu.vector_store %arg8[%c0_136, %c1024], %164 {strides = array<i32>} : memref<128x1152xf32, #tpu.memory_space<vmem>>, vector<128x128xf32>,
    %c0_137 = arith.constant 0 : index
    %c0_138 = arith.constant 0 : index
    %166 = vector.load %arg5[%c0_137, %c0_138] : memref<32x1152xf32, #tpu.memory_space<vmem>>, vector<32x1152xf32>
    %c0_139 = arith.constant 0 : index
    %c0_140 = arith.constant 0 : index
    %167 = vector.load %arg8[%c0_139, %c0_140] : memref<128x1152xf32, #tpu.memory_space<vmem>>, vector<128x1152xf32>
    %cst_141 = arith.constant dense<0.000000e+00> : vector<32x128xf32>
    %168 = tpu.matmul %166, %167, %cst_141 {dimension_numbers = #tpu.dot_dimension_numbers<[1], [1], [0], [0], [0, 0, 1, 0], [], []>} : vector<32x1152xf32>, vector<128x1152xf32>, vector<32x128xf32> -> vector<32x128xf32>
    %169 = arith.negf %168 : vector<32x128xf32>
    %170 = math.exp %169 : vector<32x128xf32>
    %cst_142 = arith.constant 1.000000e+00 : f32
    %171 = vector.broadcast %cst_142 : f32 to vector<32x128xf32>
    %172 = arith.addf %171, %170 : vector<32x128xf32>
    %173 = arith.divf %171, %172 : vector<32x128xf32>
    %c0_143 = arith.constant 0 : index
    %c0_144 = arith.constant 0 : index
    %174 = vector.load %arg6[%c0_143, %c0_144] : memref<32x128xf32, #tpu.memory_space<vmem>>, vector<32x128xf32>
    tpu.vector_store %arg6[%c0_143, %c0_144], %173 {strides = array<i32>} : memref<32x128xf32, #tpu.memory_space<vmem>>, vector<32x128xf32>,
    return
  }
  func.func @transform_0(%arg0: i32) -> (i32, i32) {
    %c0_i32 = arith.constant 0 : i32
    %c0_i32_0 = arith.constant 0 : i32
    %c0_i32_1 = arith.constant 0 : i32
    return %c0_i32, %c0_i32_0 : i32, i32
  }
  func.func @transform_1(%arg0: i32) -> (i32, i32) {
    %c0_i32 = arith.constant 0 : i32
    %c0_i32_0 = arith.constant 0 : i32
    %c0_i32_1 = arith.constant 0 : i32
    return %c0_i32, %c0_i32_0 : i32, i32
  }
  func.func @transform_2(%arg0: i32) -> (i32, i32, i32) {
    %c0_i32 = arith.constant 0 : i32
    %c0_i32_0 = arith.constant 0 : i32
    %c0_i32_1 = arith.constant 0 : i32
    %c0_i32_2 = arith.constant 0 : i32
    return %c0_i32, %c0_i32_0, %c0_i32_1 : i32, i32, i32
  }
  func.func @transform_3(%arg0: i32) -> (i32, i32, i32) {
    %c0_i32 = arith.constant 0 : i32
    %c0_i32_0 = arith.constant 0 : i32
    %c0_i32_1 = arith.constant 0 : i32
    %c0_i32_2 = arith.constant 0 : i32
    return %c0_i32, %c0_i32_0, %c0_i32_1 : i32, i32, i32
  }
  func.func @transform_4(%arg0: i32) -> (i32, i32) {
    %c0_i32 = arith.constant 0 : i32
    %c0_i32_0 = arith.constant 0 : i32
    %c0_i32_1 = arith.constant 0 : i32
    return %c0_i32, %c0_i32_0 : i32, i32
  }
  func.func @transform_5(%arg0: i32) -> (i32, i32) {
    %c0_i32 = arith.constant 0 : i32
    %c0_i32_0 = arith.constant 0 : i32
    %c0_i32_1 = arith.constant 0 : i32
    return %c0_i32, %c0_i32_0 : i32, i32
  }
}

</mosaic_0001>

<bundles_post_ra>
// kernel: dcgan_gu_forward.1
= control target key start
LH: loop header
LB: loop body
LE: loop exit
PB: predicated region body
PF: predicated region fallthrough
CT: control target
= control target key end

     0   :  { %vm32_vm0 = vcmask 523264   ;;  %v1760_v12 = vmov 0.0   ;;  %v163_v44 = vlaneseq  ;;  %s2320_s1 = inlined_call_operand.vmem [shape: f32[64,128], index: 1, kind: input, shape index: {}]   ;;  %s2321_s0 = inlined_call_operand.vmem [shape: f32[32,64], index: 0, kind: input, shape index: {}]   ;;  %s2322_s2 = inlined_call_operand.vmem [shape: f32[2,1,128], index: 2, kind: input, shape index: {}]   ;;  %s2323_s3 = inlined_call_operand.vmem [shape: f32[2,1,128], index: 3, kind: input, shape index: {}]   ;;  %s2324_s4 = inlined_call_operand.vmem [shape: f32[32,1152], index: 4, kind: input, shape index: {}]   ;;  %s2325_s5 = inlined_call_operand.vmem [shape: f32[32,128], index: 5, kind: output, shape index: {}]  }
   0x1   :  { %v31_v0 = vld [vmem:[%s2320_s1 + $0x38] sm:$0xff]  ;;  %v30_v1 = vld [vmem:[%s2320_s1 + $0x30] sm:$0xff]  ;;  %v29_v2 = vld [vmem:[%s2320_s1 + $0x28] sm:$0xff]  ;;  %244 = vst [vmem:[#allocation2 + $0x10] sm:$0xff] %v1760_v12 }
   0x2   :  { %1678 = vmatprep.subr.mxu0 %v31_v0  ;;  %v20_v3 = vld [vmem:[%s2321_s0] sm:$0xff]  ;;  %v27_v5 = vld [vmem:[%s2320_s1 + $0x18] sm:$0xff]  ;;  %v26_v6 = vld [vmem:[%s2320_s1 + $0x10] sm:$0xff]  ;;  %246 = vst [vmem:[#allocation2 + $0x20] sm:$0xff] %v1760_v12  ;;  %v1872_v45 = vshrl.u32 %v163_v44, 7 }
   0x3   :  { %1679 = vmatpush3.msra.mxu0 %v31_v0  ;;  %1694 = vmatprep.mubr.msk.f32.mxu0 %vm32_vm0, %v20_v3  ;;  %v28_v4 = vld [vmem:[%s2320_s1 + $0x20] sm:$0xff]  ;;  %v25_v7 = vld [vmem:[%s2320_s1 + $0x8] sm:$0xff]  ;;  %v22_v10 = vld [vmem:[%s2321_s0 + $0x10] sm:$0xff]  ;;  %248 = vst [vmem:[#allocation2 + $0x30] sm:$0xff] %v1760_v12 }
   0x4   :  { %1680 = vmatprep.subr.mxu0 %v30_v1  ;;  %v24_v8 = vld [vmem:[%s2320_s1] sm:$0xff]  ;;  %v21_v9 = vld [vmem:[%s2321_s0 + $0x8] sm:$0xff]  ;;  %v23_v11 = vld [vmem:[%s2321_s0 + $0x18] sm:$0xff]  ;;  %250 = vst [vmem:[#allocation2 + $0x40] sm:$0xff] %v1760_v12  ;;  %v1878_v47 = vsub.s32 0, %v1872_v45 }
   0x5   :  { %1681 = vmatpush3.msra.mxu0 %v30_v1  ;;  %252 = vst [vmem:[#allocation2 + $0x50] sm:$0xff] %v1760_v12  ;;  %253 = vst [vmem:[#allocation2 + $0x58] sm:$0x3] %v1760_v12  ;;  %v158_v46 = vld [vmem:[%s2322_s2] sm:$0x1] }
   0x6   :  { %1682 = vmatprep.subr.mxu0 %v29_v2  ;;  %254 = vst [vmem:[#allocation2 + $0x60] sm:$0xff] %v1760_v12  ;;  %255 = vst [vmem:[#allocation2 + $0x68] sm:$0x3] %v1760_v12  ;;  %v160_v50 = vld [vmem:[%s2323_s3] sm:$0x1] }
   0x7   :  { %1683 = vmatpush3.msra.mxu0 %v29_v2  ;;  %256 = vst [vmem:[#allocation2 + $0x70] sm:$0xff] %v1760_v12  ;;  %258 = vst [vmem:[#allocation2 + $0x80] sm:$0xff] %v1760_v12 }
   0x8   :  { %1684 = vmatprep.subr.mxu0 %v28_v4  ;;  %272 = vst [vmem:[#allocation2 + $0xf0] sm:$0xff] %v1760_v12  ;;  %273 = vst [vmem:[#allocation2 + $0xf8] sm:$0x3] %v1760_v12 }
   0x9   :  { %1685 = vmatpush3.msra.mxu0 %v28_v4  ;;  %274 = vst [vmem:[#allocation2 + $0x100] sm:$0xff] %v1760_v12  ;;  %275 = vst [vmem:[#allocation2 + $0x108] sm:$0x3] %v1760_v12 }
   0xa   :  { %1686 = vmatprep.subr.mxu0 %v27_v5  ;;  %242 = vst [vmem:[#allocation2] sm:$0xff] %v1760_v12  ;;  %243 = vst [vmem:[#allocation2 + $0x8] sm:$0x3] %v1760_v12 }
   0xb   :  { %1687 = vmatpush3.msra.mxu0 %v27_v5  ;;  %245 = vst [vmem:[#allocation2 + $0x18] sm:$0x3] %v1760_v12  ;;  %247 = vst [vmem:[#allocation2 + $0x28] sm:$0x3] %v1760_v12 }
   0xc   :  { %1688 = vmatprep.subr.mxu0 %v26_v6  ;;  %249 = vst [vmem:[#allocation2 + $0x38] sm:$0x3] %v1760_v12  ;;  %251 = vst [vmem:[#allocation2 + $0x48] sm:$0x3] %v1760_v12 }
   0xd   :  { %1689 = vmatpush3.msra.mxu0 %v26_v6  ;;  %257 = vst [vmem:[#allocation2 + $0x78] sm:$0x3] %v1760_v12  ;;  %259 = vst [vmem:[#allocation2 + $0x88] sm:$0x3] %v1760_v12 }
   0xe   :  { %1690 = vmatprep.subr.mxu0 %v25_v7  ;;  %260 = vst [vmem:[#allocation2 + $0x90] sm:$0xff] %v1760_v12  ;;  %261 = vst [vmem:[#allocation2 + $0x98] sm:$0x3] %v1760_v12 }
   0xf   :  { %1691 = vmatpush3.msra.mxu0 %v25_v7  ;;  %262 = vst [vmem:[#allocation2 + $0xa0] sm:$0xff] %v1760_v12  ;;  %263 = vst [vmem:[#allocation2 + $0xa8] sm:$0x3] %v1760_v12 }
  0x10   :  { %1692 = vmatprep.subr.mxu0 %v24_v8  ;;  %264 = vst [vmem:[#allocation2 + $0xb0] sm:$0xff] %v1760_v12  ;;  %265 = vst [vmem:[#allocation2 + $0xb8] sm:$0x3] %v1760_v12 }
  0x11   :  { %1693 = vmatpush3.msra.mxu0 %v24_v8  ;;  %266 = vst [vmem:[#allocation2 + $0xc0] sm:$0xff] %v1760_v12  ;;  %267 = vst [vmem:[#allocation2 + $0xc8] sm:$0x3] %v1760_v12 }
  0x12   :  { %1695 = vmatmul.mubr.msk.f32.vlgmr.msra.gmra.mxu0 %vm32_vm0, %v21_v9  ;;  %268 = vst [vmem:[#allocation2 + $0xd0] sm:$0xff] %v1760_v12  ;;  %269 = vst [vmem:[#allocation2 + $0xd8] sm:$0x3] %v1760_v12 }
  0x13   :  { %1697 = vmatprep.mubr.msk.f32.mxu0 %vm32_vm0, %v22_v10  ;;  %270 = vst [vmem:[#allocation2 + $0xe0] sm:$0xff] %v1760_v12  ;;  %271 = vst [vmem:[#allocation2 + $0xe8] sm:$0x3] %v1760_v12 }
  0x14   :  { %276 = vst [vmem:[#allocation2 + $0x110] sm:$0xff] %v1760_v12  ;;  %277 = vst [vmem:[#allocation2 + $0x118] sm:$0x3] %v1760_v12 }
  0x15   :  { %278 = vst [vmem:[#allocation2 + $0x120] sm:$0xff] %v1760_v12  ;;  %279 = vst [vmem:[#allocation2 + $0x128] sm:$0x3] %v1760_v12 }
  0x16   :  { %1698 = vmatmul.mubr.msk.f32.gmra.mxu0 %vm32_vm0, %v23_v11  ;;  %280 = vst [vmem:[#allocation2 + $0x130] sm:$0xff] %v1760_v12  ;;  %281 = vst [vmem:[#allocation2 + $0x138] sm:$0x3] %v1760_v12 }
  0xd2   :  { %v1696_v13 = vpop.f32.mrf.mxu0 }
  0xd3   :  { %v140_v17 = vmul.f32 %v1696_v13, %v1696_v13 }
  0xd4   :  { %v111_v14 = vpop.f32.mrf.mxu0 }
  0xd5   :  { %v139_v15 = vmul.f32 %v111_v14, %v111_v14  ;;  %v130_v18 = vadd.f32 %v1696_v13, %v111_v14 }
  0xd6   :  { %v1699_v16 = vpop.f32.mrf.mxu0 }
  0xd7   :  { %v143_v20 = vadd.f32 %v140_v17, %v139_v15  ;;  %v142_v23 = vmul.f32 %v1699_v16, %v1699_v16 }
  0xd8   :  { %v121_v19 = vpop.f32.mrf.mxu0 }
  0xd9   :  { %v131_v21 = vadd.f32 %v130_v18, %v121_v19  ;;  %v141_v22 = vmul.f32 %v121_v19, %v121_v19 }
  0xdb   :  { %v132_v24 = vadd.f32 %v1699_v16, %v131_v21  ;;  %v144_v25 = vadd.f32 %v143_v20, %v141_v22 }
  0xdd   :  { %v133_v26 = vrot.slane %v132_v24, 4  ;;  %v145_v27 = vadd.f32 %v144_v25, %v142_v23 }
  0xdf   :  { %v134_v28 = vadd.f32 %v133_v26, %v132_v24  ;;  %v146_v29 = vrot.slane %v145_v27, 4 }
  0xe1   :  { %v135_v30 = vrot.slane %v134_v28, 2  ;;  %v147_v31 = vadd.f32 %v146_v29, %v145_v27  ;;  %v1000_v29 = vld [vmem:[%s2324_s4 + $0x8] sm:$0xff] }
  0xe2   :  { %1243 = vmatprep.mubr.f32.mxu1 %v1000_v29 }
  0xe3   :  { %v136_v32 = vadd.f32 %v135_v30, %v134_v28  ;;  %v148_v33 = vrot.slane %v147_v31, 2 }
  0xe5   :  { %v137_v34 = vrot.slane %v136_v32, 1  ;;  %v149_v35 = vadd.f32 %v148_v33, %v147_v31  ;;  %v1002_v31 = vld [vmem:[%s2324_s4 + $0x18] sm:$0xff]  ;;  %v1640_v33 = vld [vmem:[%s2322_s2 + $0x1] sm:$0x1] }
  0xe6   :  { %1328 = vmatprep.mubr.f32.mxu0 %v1002_v31 }
  0xe7   :  { %v138_v36 = vadd.f32 %v137_v34, %v136_v32  ;;  %v150_v37 = vrot.slane %v149_v35, 1 }
  0xe9   :  { %v151_v38 = vadd.f32 %v150_v37, %v149_v35  ;;  %v152_v39 = vmul.f32 0.03125, %v138_v36  ;;  %v1761_v35 = vmov 1966171168  }
  0xea   :  { %v284_v36 = vunpack.c.l.s4 %v1761_v35 }
  0xeb   :  { %v153_v40 = vmul.f32 0.03125, %v151_v38  ;;  %v154_v41 = vmul.f32 %v152_v39, %v152_v39  ;;  %v1641_v38 = vld [vmem:[%s2323_s3 + $0x1] sm:$0x1] }
  0xed   :  { %v155_v42 = vsub.f32 %v153_v40, %v154_v41  ;;  %v285_v41 = vunpack.c.0.s8 %v284_v36 }
  0xef   :  { %v156_v43 = vadd.f32 1e-05, %v155_v42 }
  0xf1   :  { %1740 = vrsqrt.f32 %v156_v43 }
  0xfe   :  { %v1741_v48 = vpop.eup %1740 }
  0xff   :  { %v159_v49 = vmul.f32 %v1741_v48, %v158_v46 }
 0x101   :  { %v161_v51 = vmul.f32 %v159_v49, %v152_v39  ;;  %v166_v52 = vrot.slane %v159_v49, %v1878_v47 }
 0x103   :  { %v162_v53 = vsub.f32 %v160_v50, %v161_v51  ;;  %v167_v54 = vmul.f32 %v166_v52, %v111_v14  ;;  %v168_v55 = vmul.f32 %v1696_v13, %v166_v52  ;;  %v169_v56 = vmul.f32 %v166_v52, %v121_v19 }
 0x104   :  { %v170_v57 = vmul.f32 %v1699_v16, %v166_v52  ;;  %v1900_v50 = vsub.s32 %v285_v41, %v1872_v45 }
 0x105   :  { %v175_v58 = vrot.slane %v162_v53, %v1878_v47 }
 0x107   :  { %v177_v59 = vadd.f32 %v175_v58, %v167_v54  ;;  %v178_v60 = vadd.f32 %v175_v58, %v168_v55  ;;  %v179_v61 = vadd.f32 %v175_v58, %v169_v56  ;;  %v180_v62 = vadd.f32 %v175_v58, %v170_v57 }
 0x109   :  { %v181_v63 = vmax.f32 %v177_v59, 0.0  ;;  %v182_v0 = vmax.f32 %v178_v60, 0.0  ;;  %v183_v1 = vmax.f32 %v179_v61, 0.0  ;;  %v184_v2 = vmax.f32 %v180_v62, 0.0 }
 0x10b   :  { %v185_v3 = vadd.f32 %v182_v0, %v181_v63  ;;  %v194_v4 = vmul.f32 %v181_v63, %v181_v63  ;;  %v195_v5 = vmul.f32 %v182_v0, %v182_v0  ;;  %v196_v7 = vmul.f32 %v183_v1, %v183_v1 }
 0x10c   :  { %v197_v10 = vmul.f32 %v184_v2, %v184_v2 }
 0x10d   :  { %v186_v6 = vadd.f32 %v185_v3, %v183_v1  ;;  %v198_v8 = vadd.f32 %v195_v5, %v194_v4 }
 0x10f   :  { %v187_v9 = vadd.f32 %v186_v6, %v184_v2  ;;  %v199_v11 = vadd.f32 %v198_v8, %v196_v7 }
 0x111   :  { %v188_v13 = vrot.slane %v187_v9, 4  ;;  %v200_v14 = vadd.f32 %v199_v11, %v197_v10 }
 0x113   :  { %v189_v15 = vadd.f32 %v188_v13, %v187_v9  ;;  %v201_v16 = vrot.slane %v200_v14, 4 }
 0x115   :  { %v190_v17 = vrot.slane %v189_v15, 2  ;;  %v202_v18 = vadd.f32 %v201_v16, %v200_v14 }
 0x117   :  { %v191_v19 = vadd.f32 %v190_v17, %v189_v15  ;;  %v203_v20 = vrot.slane %v202_v18, 2 }
 0x119   :  { %v192_v21 = vrot.slane %v191_v19, 1  ;;  %v204_v22 = vadd.f32 %v203_v20, %v202_v18 }
 0x11b   :  { %v193_v23 = vadd.f32 %v192_v21, %v191_v19  ;;  %v205_v24 = vrot.slane %v204_v22, 1 }
 0x11d   :  { %v206_v25 = vadd.f32 %v205_v24, %v204_v22  ;;  %v207_v26 = vmul.f32 0.03125, %v193_v23 }
 0x11f   :  { %v208_v27 = vmul.f32 0.03125, %v206_v25  ;;  %v209_v28 = vmul.f32 %v207_v26, %v207_v26 }
 0x121   :  { %v210_v30 = vsub.f32 %v208_v27, %v209_v28 }
 0x123   :  { %v211_v32 = vadd.f32 1e-05, %v210_v30 }
 0x125   :  { %1742 = vrsqrt.f32 %v211_v32 }
 0x132   :  { %v1743_v34 = vpop.eup %1742 }
 0x133   :  { %v215_v37 = vmul.f32 %v1743_v34, %v1640_v33 }
 0x135   :  { %v218_v39 = vmul.f32 %v215_v37, %v207_v26  ;;  %v223_v40 = vrot.slane %v215_v37, %v1878_v47 }
 0x137   :  { %v219_v42 = vsub.f32 %v1641_v38, %v218_v39  ;;  %v224_v43 = vmul.f32 %v223_v40, %v181_v63  ;;  %v225_v44 = vmul.f32 %v223_v40, %v182_v0  ;;  %v226_v46 = vmul.f32 %v223_v40, %v183_v1 }
 0x138   :  { %v227_v48 = vmul.f32 %v223_v40, %v184_v2 }
 0x139   :  { %v232_v49 = vrot.slane %v219_v42, %v1878_v47 }
 0x13b   :  { %v234_v51 = vadd.f32 %v232_v49, %v224_v43  ;;  %v235_v52 = vadd.f32 %v232_v49, %v225_v44  ;;  %v236_v53 = vadd.f32 %v232_v49, %v226_v46  ;;  %v237_v54 = vadd.f32 %v232_v49, %v227_v48 }
 0x13d   :  { %v238_v55 = vmax.f32 %v234_v51, 0.0  ;;  %v239_v56 = vmax.f32 %v235_v52, 0.0  ;;  %v1902_v57 = vmax.f32 %v236_v53, 0.0  ;;  %v1904_v58 = vmax.f32 %v237_v54, 0.0 }
 0x13f   :  { %v289_v59 = vrot.slane %v238_v55, %v1900_v50  ;;  %v336_v60 = vcombine.high %v238_v55, %v238_v55  ;;  %v396_v61 = vrot.slane %v239_v56, %v1900_v50  ;;  %v443_v62 = vcombine.high %v239_v56, %v239_v56 }
 0x140   :  { %v503_v45 = vrot.slane %v1902_v57, %v1900_v50  ;;  %v550_v63 = vcombine.high %v1902_v57, %v1902_v57  ;;  %v1914_v0 = vrot.slane %v1904_v58, %v1900_v50  ;;  %v657_v1 = vcombine.high %v1904_v58, %v1904_v58 }
 0x141   :  { %v290_v2 = vcombine.high %v289_v59, %v289_v59  ;;  %v297_v3 = vrot.slane %v289_v59, %v1900_v50  ;;  %v343_v4 = vrot.slane %v336_v60, %v1900_v50  ;;  %v397_v5 = vcombine.high %v396_v61, %v396_v61 }
 0x142   :  { %v404_v6 = vrot.slane %v396_v61, %v1900_v50  ;;  %v450_v7 = vrot.slane %v443_v62, %v1900_v50  ;;  %v504_v8 = vcombine.high %v503_v45, %v503_v45  ;;  %v511_v9 = vrot.slane %v503_v45, %v1900_v50 }
 0x143   :  { %v304_v10 = vrot.slane %v290_v2, %v1900_v50  ;;  %v308_v11 = vrot.slane %v297_v3, %v1878_v47  ;;  %v320_v13 = vcombine.high %v297_v3, %v297_v3  ;;  %v344_v14 = vcombine.high %v343_v4, %v343_v4 }
 0x144   :  { %v351_v15 = vrot.slane %v343_v4, %v1900_v50  ;;  %v411_v16 = vrot.slane %v397_v5, %v1900_v50  ;;  %v415_v17 = vrot.slane %v404_v6, %v1878_v47  ;;  %v427_v18 = vcombine.high %v404_v6, %v404_v6 }
 0x145   :  { %v312_v19 = vrot.slane %v304_v10, %v1878_v47  ;;  %316 = vst [vmem:[#allocation2 + $0x11] sm:$0x3] %v308_v11  ;;  %317 = vst [vmem:[#allocation2 + $0x21] sm:$0x3] %v308_v11  ;;  %v321_v20 = vcombine.high %v304_v10, %v304_v10  ;;  %v325_v21 = vrot.slane %v320_v13, %v1878_v47 }
 0x146   :  { %v358_v22 = vrot.slane %v344_v14, %v1900_v50  ;;  %v362_v23 = vrot.slane %v351_v15, %v1878_v47  ;;  %v373_v24 = vcombine.high %v351_v15, %v351_v15  ;;  %v419_v25 = vrot.slane %v411_v16, %v1878_v47  ;;  %423 = vst [vmem:[#allocation2 + $0x31] sm:$0x3] %v415_v17 }
 0x147   :  { %424 = vst [vmem:[#allocation2 + $0x41] sm:$0x3] %v415_v17  ;;  %v428_v26 = vcombine.high %v411_v16, %v411_v16  ;;  %v329_v27 = vrot.slane %v321_v20, %v1878_v47  ;;  %v432_v30 = vrot.slane %v427_v18, %v1878_v47  ;;  %332 = vst [vmem:[#allocation2 + $0x13] sm:$0x3] %v325_v21 }
 0x148   :  { %v366_v28 = vrot.slane %v358_v22, %v1878_v47  ;;  %v374_v29 = vcombine.high %v358_v22, %v358_v22  ;;  %333 = vst [vmem:[#allocation2 + $0x23] sm:$0x3] %v325_v21  ;;  %318 = vst [vmem:[#allocation2 + $0xb1] sm:$0x3] %v312_v19  ;;  %v378_v31 = vrot.slane %v373_v24, %v1878_v47 }
 0x149   :  { %319 = vst [vmem:[#allocation2 + $0xc1] sm:$0x3] %v312_v19  ;;  %v436_v32 = vrot.slane %v428_v26, %v1878_v47  ;;  %v451_v33 = vcombine.high %v450_v7, %v450_v7  ;;  %v458_v34 = vrot.slane %v450_v7, %v1900_v50  ;;  %369 = vst [vmem:[#allocation2 + $0x15] sm:$0x3] %v362_v23 }
 0x14a   :  { %370 = vst [vmem:[#allocation2 + $0x25] sm:$0x3] %v362_v23  ;;  %425 = vst [vmem:[#allocation2 + $0xd1] sm:$0x3] %v419_v25  ;;  %v382_v35 = vrot.slane %v374_v29, %v1878_v47  ;;  %v518_v36 = vrot.slane %v504_v8, %v1900_v50  ;;  %v522_v37 = vrot.slane %v511_v9, %v1878_v47 }
 0x14b   :  { %426 = vst [vmem:[#allocation2 + $0xe1] sm:$0x3] %v419_v25  ;;  %v534_v38 = vcombine.high %v511_v9, %v511_v9  ;;  %439 = vst [vmem:[#allocation2 + $0x33] sm:$0x3] %v432_v30  ;;  %v465_v39 = vrot.slane %v451_v33, %v1900_v50  ;;  %v469_v40 = vrot.slane %v458_v34, %v1878_v47 }
 0x14c   :  { %440 = vst [vmem:[#allocation2 + $0x43] sm:$0x3] %v432_v30  ;;  %334 = vst [vmem:[#allocation2 + $0xb3] sm:$0x3] %v329_v27  ;;  %v480_v41 = vcombine.high %v458_v34, %v458_v34  ;;  %v557_v42 = vrot.slane %v550_v63, %v1900_v50  ;;  %v526_v43 = vrot.slane %v518_v36, %v1878_v47 }
 0x14d   :  { %335 = vst [vmem:[#allocation2 + $0xc3] sm:$0x3] %v329_v27  ;;  %371 = vst [vmem:[#allocation2 + $0xb5] sm:$0x3] %v366_v28  ;;  %v535_v44 = vcombine.high %v518_v36, %v518_v36  ;;  %v539_v46 = vrot.slane %v534_v38, %v1878_v47  ;;  %v611_v48 = vcombine.high %v1914_v0, %v1914_v0  ;;  %v750_v36 = vld [vmem:[#allocation2 + $0xa1] sm:$0xff] }
 0x14e   :  { %372 = vst [vmem:[#allocation2 + $0xc5] sm:$0x3] %v366_v28  ;;  %385 = vst [vmem:[#allocation2 + $0x17] sm:$0x3] %v378_v31  ;;  %v473_v49 = vrot.slane %v465_v39, %v1878_v47  ;;  %v481_v51 = vcombine.high %v465_v39, %v465_v39  ;;  %v485_v52 = vrot.slane %v480_v41, %v1878_v47  ;;  %v782_v39 = vld [vmem:[#allocation2 + $0xa2] sm:$0xff] }
 0x14f   :  { %386 = vst [vmem:[#allocation2 + $0x27] sm:$0x3] %v378_v31  ;;  %441 = vst [vmem:[#allocation2 + $0xd3] sm:$0x3] %v436_v32  ;;  %v558_v53 = vcombine.high %v557_v42, %v557_v42  ;;  %v543_v54 = vrot.slane %v535_v44, %v1878_v47  ;;  %v565_v55 = vrot.slane %v557_v42, %v1900_v50 }
 0x150   :  { %442 = vst [vmem:[#allocation2 + $0xe3] sm:$0x3] %v436_v32  ;;  %530 = vst [vmem:[#allocation2 + $0x51] sm:$0x3] %v522_v37  ;;  %v618_v56 = vrot.slane %v1914_v0, %v1900_v50  ;;  %v625_v57 = vrot.slane %v611_v48, %v1900_v50  ;;  %v489_v59 = vrot.slane %v481_v51, %v1878_v47 }
 0x151   :  { %531 = vst [vmem:[#allocation2 + $0x61] sm:$0x3] %v522_v37  ;;  %387 = vst [vmem:[#allocation2 + $0xb7] sm:$0x3] %v382_v35  ;;  %v572_v60 = vrot.slane %v558_v53, %v1900_v50  ;;  %v664_v61 = vrot.slane %v657_v1, %v1900_v50  ;;  %v576_v62 = vrot.slane %v565_v55, %v1878_v47 }
 0x152   :  { %388 = vst [vmem:[#allocation2 + $0xc7] sm:$0x3] %v382_v35  ;;  %476 = vst [vmem:[#allocation2 + $0x35] sm:$0x3] %v469_v40  ;;  %v587_v45 = vcombine.high %v565_v55, %v565_v55  ;;  %v629_v63 = vrot.slane %v618_v56, %v1878_v47  ;;  %v633_v0 = vrot.slane %v625_v57, %v1878_v47 }
 0x153   :  { %477 = vst [vmem:[#allocation2 + $0x45] sm:$0x3] %v469_v40  ;;  %532 = vst [vmem:[#allocation2 + $0xf1] sm:$0x3] %v526_v43  ;;  %v580_v2 = vrot.slane %v572_v60, %v1878_v47  ;;  %v588_v3 = vcombine.high %v572_v60, %v572_v60  ;;  %v641_v4 = vcombine.high %v618_v56, %v618_v56 }
 0x154   :  { %533 = vst [vmem:[#allocation2 + $0x101] sm:$0x3] %v526_v43  ;;  %546 = vst [vmem:[#allocation2 + $0x53] sm:$0x3] %v539_v46  ;;  %v642_v5 = vcombine.high %v625_v57, %v625_v57  ;;  %v592_v58 = vrot.slane %v587_v45, %v1878_v47  ;;  %v665_v1 = vcombine.high %v664_v61, %v664_v61 }
 0x155   :  { %547 = vst [vmem:[#allocation2 + $0x63] sm:$0x3] %v539_v46  ;;  %478 = vst [vmem:[#allocation2 + $0xd5] sm:$0x3] %v473_v49  ;;  %v672_v6 = vrot.slane %v664_v61, %v1900_v50  ;;  %v596_v7 = vrot.slane %v588_v3, %v1878_v47  ;;  %v646_v8 = vrot.slane %v641_v4, %v1878_v47  ;;  %v2108_v45 = vld [vmem:[#allocation2 + $0x11] sm:$0xff]  ;;  %v774_v3 = vld [vmem:[#allocation2 + $0x2] sm:$0xff] }
 0x156   :  { %479 = vst [vmem:[#allocation2 + $0xe5] sm:$0x3] %v473_v49  ;;  %492 = vst [vmem:[#allocation2 + $0x37] sm:$0x3] %v485_v52  ;;  %v650_v9 = vrot.slane %v642_v5, %v1878_v47  ;;  %v679_v10 = vrot.slane %v665_v1, %v1900_v50  ;;  %v2098_v60 = vld [vmem:[#allocation2 + $0x21] sm:$0xff]  ;;  %v950_v4 = vld [vmem:[#allocation2 + $0x131] sm:$0xff] }
 0x157   :  { %493 = vst [vmem:[#allocation2 + $0x47] sm:$0x3] %v485_v52  ;;  %548 = vst [vmem:[#allocation2 + $0xf3] sm:$0x3] %v543_v54  ;;  %v683_v11 = vrot.slane %v672_v6, %v1878_v47  ;;  %v694_v13 = vcombine.high %v672_v6, %v672_v6  ;;  %v2102_v61 = vld [vmem:[#allocation2 + $0x20] sm:$0xff]  ;;  %v1001_v1 = vld [vmem:[%s2324_s4 + $0x10] sm:$0xff] }
 0x158   :  { %549 = vst [vmem:[#allocation2 + $0x103] sm:$0x3] %v543_v54  ;;  %494 = vst [vmem:[#allocation2 + $0xd7] sm:$0x3] %v489_v59  ;;  %v695_v14 = vcombine.high %v679_v10, %v679_v10  ;;  %v687_v16 = vrot.slane %v679_v10, %v1878_v47  ;;  %v2038_v35 = vld [vmem:[#allocation2 + $0xb1] sm:$0xff] }
 0x159   :  { %495 = vst [vmem:[#allocation2 + $0xe7] sm:$0x3] %v489_v59  ;;  %583 = vst [vmem:[#allocation2 + $0x55] sm:$0x3] %v576_v62  ;;  %v699_v15 = vrot.slane %v694_v13, %v1878_v47  ;;  %v2028_v32 = vld [vmem:[#allocation2 + $0xc1] sm:$0xff]  ;;  %v719_v37 = vld [vmem:[#allocation2 + $0xb0] sm:$0xff] }
 0x15a   :  { %584 = vst [vmem:[#allocation2 + $0x65] sm:$0x3] %v576_v62  ;;  %637 = vst [vmem:[#allocation2 + $0x71] sm:$0x3] %v629_v63  ;;  %v703_v17 = vrot.slane %v695_v14, %v1878_v47  ;;  %v2032_v33 = vld [vmem:[#allocation2 + $0xc0] sm:$0xff]  ;;  %v2042_v38 = vld [vmem:[#allocation2 + $0xb2] sm:$0xff] }
 0x15b   :  { %638 = vst [vmem:[#allocation2 + $0x81] sm:$0x3] %v629_v63  ;;  %639 = vst [vmem:[#allocation2 + $0x111] sm:$0x3] %v633_v0  ;;  %v2034_v34 = vld [vmem:[#allocation2 + $0xc2] sm:$0xff]  ;;  %v1010_v10 = vld [vmem:[%s2324_s4 + $0x58] sm:$0xff] }
 0x15c   :  { %640 = vst [vmem:[#allocation2 + $0x121] sm:$0x3] %v633_v0  ;;  %585 = vst [vmem:[#allocation2 + $0xf5] sm:$0x3] %v580_v2  ;;  %v2104_v62 = vld [vmem:[#allocation2 + $0x22] sm:$0xff]  ;;  %v711_v0 = vld [vmem:[#allocation2 + $0x10] sm:$0xff] }
 0x15d   :  { %586 = vst [vmem:[#allocation2 + $0x105] sm:$0x3] %v580_v2  ;;  %599 = vst [vmem:[#allocation2 + $0x57] sm:$0x3] %v592_v58  ;;  %v2088_v56 = vld [vmem:[#allocation2 + $0x31] sm:$0xff]  ;;  %v742_v63 = vld [vmem:[#allocation2 + $0x1] sm:$0xff] }
 0x15e   :  { %600 = vst [vmem:[#allocation2 + $0x67] sm:$0x3] %v592_v58  ;;  %601 = vst [vmem:[#allocation2 + $0xf7] sm:$0x3] %v596_v7  ;;  %v2078_v53 = vld [vmem:[#allocation2 + $0x41] sm:$0xff]  ;;  %v2092_v57 = vld [vmem:[#allocation2 + $0x30] sm:$0xff] }
 0x15f   :  { %602 = vst [vmem:[#allocation2 + $0x107] sm:$0x3] %v596_v7  ;;  %653 = vst [vmem:[#allocation2 + $0x73] sm:$0x3] %v646_v8  ;;  %v2018_v29 = vld [vmem:[#allocation2 + $0xd1] sm:$0xff]  ;;  %v2082_v54 = vld [vmem:[#allocation2 + $0x40] sm:$0xff] }
 0x160   :  { %654 = vst [vmem:[#allocation2 + $0x83] sm:$0x3] %v646_v8  ;;  %655 = vst [vmem:[#allocation2 + $0x113] sm:$0x3] %v650_v9  ;;  %v2008_v26 = vld [vmem:[#allocation2 + $0xe1] sm:$0xff]  ;;  %v2022_v30 = vld [vmem:[#allocation2 + $0xd0] sm:$0xff] }
 0x161   :  { %656 = vst [vmem:[#allocation2 + $0x123] sm:$0x3] %v650_v9  ;;  %690 = vst [vmem:[#allocation2 + $0x75] sm:$0x3] %v683_v11  ;;  %v2012_v27 = vld [vmem:[#allocation2 + $0xe0] sm:$0xff]  ;;  %v2024_v31 = vld [vmem:[#allocation2 + $0xd2] sm:$0xff] }
 0x162   :  { %691 = vst [vmem:[#allocation2 + $0x85] sm:$0x3] %v683_v11  ;;  %692 = vst [vmem:[#allocation2 + $0x115] sm:$0x3] %v687_v16  ;;  %v2014_v28 = vld [vmem:[#allocation2 + $0xe2] sm:$0xff]  ;;  %v2094_v59 = vld [vmem:[#allocation2 + $0x32] sm:$0xff] }
 0x163   :  { %693 = vst [vmem:[#allocation2 + $0x125] sm:$0x3] %v687_v16  ;;  %706 = vst [vmem:[#allocation2 + $0x77] sm:$0x3] %v699_v15  ;;  %v2084_v55 = vld [vmem:[#allocation2 + $0x42] sm:$0xff]  ;;  %v2112_v2 = vld [vmem:[#allocation2 + $0x12] sm:$0xff] }
 0x164   :  { %707 = vst [vmem:[#allocation2 + $0x87] sm:$0x3] %v699_v15  ;;  %708 = vst [vmem:[#allocation2 + $0x117] sm:$0x3] %v703_v17  ;;  %v2068_v49 = vld [vmem:[#allocation2 + $0x51] sm:$0xff]  ;;  %v999_v58 = vld [vmem:[%s2324_s4] sm:$0xff] }
 0x165   :  { %709 = vst [vmem:[#allocation2 + $0x127] sm:$0x3] %v703_v17  ;;  %v1998_v23 = vld [vmem:[#allocation2 + $0xf1] sm:$0xff]  ;;  %v2058_v44 = vld [vmem:[#allocation2 + $0x61] sm:$0xff] }
 0x166   :  { %v1988_v47 = vld [vmem:[#allocation2 + $0x101] sm:$0xff]  ;;  %v2002_v24 = vld [vmem:[#allocation2 + $0xf0] sm:$0xff]  ;;  %v1018_v11 = vld [vmem:[%s2324_s4 + $0x98] sm:$0xff] }
 0x167   :  { %v1992_v21 = vld [vmem:[#allocation2 + $0x100] sm:$0xff]  ;;  %v2004_v25 = vld [vmem:[#allocation2 + $0xf2] sm:$0xff]  ;;  %v1008_v9 = vld [vmem:[%s2324_s4 + $0x48] sm:$0xff] }
 0x168   :  { %v1994_v22 = vld [vmem:[#allocation2 + $0x102] sm:$0xff]  ;;  %v2072_v51 = vld [vmem:[#allocation2 + $0x50] sm:$0xff] }
 0x169   :  { %v2062_v46 = vld [vmem:[#allocation2 + $0x60] sm:$0xff]  ;;  %v2074_v52 = vld [vmem:[#allocation2 + $0x52] sm:$0xff]  ;;  %v1020_v13 = vld [vmem:[%s2324_s4 + $0xa8] sm:$0xff] }
 0x16a   :  { %v2046_v40 = vld [vmem:[#allocation2 + $0x71] sm:$0xff]  ;;  %v2064_v48 = vld [vmem:[#allocation2 + $0x62] sm:$0xff] }
 0x16b   :  { %v1976_v50 = vld [vmem:[#allocation2 + $0x111] sm:$0xff]  ;;  %v2048_v41 = vld [vmem:[#allocation2 + $0x80] sm:$0xff] }
 0x16c   :  { %v1978_v18 = vld [vmem:[#allocation2 + $0x120] sm:$0xff]  ;;  %v1980_v19 = vld [vmem:[#allocation2 + $0x110] sm:$0xff]  ;;  %1179 = vmatprep.subr.mxu1 %v1976_v50 }
 0x16d   :  { %1264 = vmatprep.subr.mxu0 %v1978_v18  ;;  %v1984_v20 = vld [vmem:[#allocation2 + $0x112] sm:$0xff]  ;;  %1180 = vmatpush1.xpose.msra.mxu1 %v1980_v19  ;;  %v2116_v5 = vld [vmem:[#allocation2 + $0x122] sm:$0xff] }
 0x16e   :  { %1265 = vmatpush1.xpose.msra.mxu0 %v1984_v20  ;;  %1181 = vmatprep.subr.mxu1 %v1988_v47  ;;  %v2052_v42 = vld [vmem:[#allocation2 + $0x70] sm:$0xff]  ;;  %v853_v6 = vld [vmem:[#allocation2 + $0x121] sm:$0xff] }
 0x16f   :  { %1266 = vmatprep.subr.mxu0 %v1980_v19  ;;  %v2054_v43 = vld [vmem:[#allocation2 + $0x72] sm:$0xff]  ;;  %v1011_v8 = vld [vmem:[%s2324_s4 + $0x60] sm:$0xff] }
 0x170   :  { %v1009_v7 = vld [vmem:[%s2324_s4 + $0x50] sm:$0xff]  ;;  %v1019_v15 = vld [vmem:[%s2324_s4 + $0xa0] sm:$0xff] }
 0x171   :  { %1182 = vmatpush1.xpose.msra.mxu1 %v1992_v21  ;;  %v1017_v14 = vld [vmem:[%s2324_s4 + $0x90] sm:$0xff]  ;;  %v1027_v16 = vld [vmem:[%s2324_s4 + $0xe0] sm:$0xff] }
 0x172   :  { %1267 = vmatpush1.xpose.msra.mxu0 %v1994_v22  ;;  %1183 = vmatprep.subr.mxu1 %v1998_v23  ;;  %v1029_v17 = vld [vmem:[%s2324_s4 + $0xf0] sm:$0xff] }
 0x173   :  { %1268 = vmatprep.subr.mxu0 %v1992_v21 }
 0x175   :  { %1184 = vmatpush1.xpose.msra.mxu1 %v2002_v24 }
 0x176   :  { %1269 = vmatpush1.xpose.msra.mxu0 %v2004_v25  ;;  %1185 = vmatprep.subr.mxu1 %v2008_v26 }
 0x177   :  { %1270 = vmatprep.subr.mxu0 %v2002_v24 }
 0x179   :  { %1186 = vmatpush1.xpose.msra.mxu1 %v2012_v27 }
 0x17a   :  { %1271 = vmatpush1.xpose.msra.mxu0 %v2014_v28  ;;  %1187 = vmatprep.subr.mxu1 %v2018_v29 }
 0x17b   :  { %1272 = vmatprep.subr.mxu0 %v2012_v27 }
 0x17d   :  { %1188 = vmatpush1.xpose.msra.mxu1 %v2022_v30 }
 0x17e   :  { %1273 = vmatpush1.xpose.msra.mxu0 %v2024_v31  ;;  %1189 = vmatprep.subr.mxu1 %v2028_v32 }
 0x17f   :  { %1274 = vmatprep.subr.mxu0 %v2022_v30 }
 0x181   :  { %1190 = vmatpush1.xpose.msra.mxu1 %v2032_v33 }
 0x182   :  { %1275 = vmatpush1.xpose.msra.mxu0 %v2034_v34  ;;  %1191 = vmatprep.subr.mxu1 %v2038_v35 }
 0x183   :  { %1276 = vmatprep.subr.mxu0 %v2032_v33 }
 0x185   :  { %1192 = vmatpush1.xpose.msra.mxu1 %v719_v37 }
 0x186   :  { %1277 = vmatpush1.xpose.msra.mxu0 %v2042_v38  ;;  %1193 = vmatprep.subr.mxu1 %v750_v36  ;;  %v1006_v36 = vld [vmem:[%s2324_s4 + $0x38] sm:$0xff] }
 0x187   :  { %1278 = vmatprep.subr.mxu0 %v719_v37  ;;  %v1021_v37 = vld [vmem:[%s2324_s4 + $0xb0] sm:$0xff] }
 0x189   :  { %1194 = vmatpush1.xpose.msra.mxu1 %v1760_v12 }
 0x18a   :  { %1279 = vmatpush1.xpose.msra.mxu0 %v782_v39  ;;  %1195 = vmatprep.subr.mxu1 %v2046_v40  ;;  %v1031_v39 = vld [vmem:[%s2324_s4 + $0x100] sm:$0xff] }
 0x18b   :  { %1280 = vmatprep.subr.mxu0 %v2048_v41 }
 0x18d   :  { %1196 = vmatpush1.xpose.msra.mxu1 %v2052_v42 }
 0x18e   :  { %1281 = vmatpush1.xpose.msra.mxu0 %v2054_v43  ;;  %1197 = vmatprep.subr.mxu1 %v2058_v44 }
 0x18f   :  { %1282 = vmatprep.subr.mxu0 %v2052_v42 }
 0x191   :  { %1198 = vmatpush1.xpose.msra.mxu1 %v2062_v46 }
 0x192   :  { %1283 = vmatpush1.xpose.msra.mxu0 %v2064_v48  ;;  %1199 = vmatprep.subr.mxu1 %v2068_v49 }
 0x193   :  { %1284 = vmatprep.subr.mxu0 %v2062_v46 }
 0x195   :  { %1200 = vmatpush1.xpose.msra.mxu1 %v2072_v51 }
 0x196   :  { %1285 = vmatpush1.xpose.msra.mxu0 %v2074_v52  ;;  %1201 = vmatprep.subr.mxu1 %v2078_v53 }
 0x197   :  { %1286 = vmatprep.subr.mxu0 %v2072_v51 }
 0x199   :  { %1202 = vmatpush1.xpose.msra.mxu1 %v2082_v54 }
 0x19a   :  { %1287 = vmatpush1.xpose.msra.mxu0 %v2084_v55  ;;  %1203 = vmatprep.subr.mxu1 %v2088_v56 }
 0x19b   :  { %1288 = vmatprep.subr.mxu0 %v2082_v54 }
 0x19d   :  { %1204 = vmatpush1.xpose.msra.mxu1 %v2092_v57 }
 0x19e   :  { %1289 = vmatpush1.xpose.msra.mxu0 %v2094_v59  ;;  %1205 = vmatprep.subr.mxu1 %v2098_v60 }
 0x19f   :  { %1290 = vmatprep.subr.mxu0 %v2092_v57 }
 0x1a1   :  { %1206 = vmatpush1.xpose.msra.mxu1 %v2102_v61 }
 0x1a2   :  { %1291 = vmatpush1.xpose.msra.mxu0 %v2104_v62  ;;  %1207 = vmatprep.subr.mxu1 %v2108_v45 }
 0x1a3   :  { %1292 = vmatprep.subr.mxu0 %v2102_v61 }
 0x1a5   :  { %1208 = vmatpush1.xpose.msra.mxu1 %v711_v0 }
 0x1a6   :  { %1293 = vmatpush1.xpose.msra.mxu0 %v2112_v2  ;;  %1209 = vmatprep.subr.mxu1 %v742_v63 }
 0x1a7   :  { %1294 = vmatprep.subr.mxu0 %v711_v0 }
 0x1a9   :  { %1210 = vmatpush1.xpose.msra.mxu1 %v1760_v12 }
 0x1aa   :  { %1295 = vmatpush1.xpose.msra.mxu0 %v774_v3  ;;  %1349 = vmatprep.subr.mxu1 %v2116_v5 }
 0x1ab   :  { %1434 = vmatprep.subr.mxu0 %v950_v4 }
 0x1ac   :  { %1244 = vmatmul.mubr.f32.vlgmr.msra.gmra.mxu1 %v999_v58 }
 0x1ad   :  { %1329 = vmatmul.mubr.f32.vlgmr.msra.gmra.mxu0 %v1001_v1  ;;  %1350 = vmatpush1.xpose.msra.mxu1 %v853_v6 }
 0x1ae   :  { %1435 = vmatpush1.xpose.msra.mxu0 %v1760_v12  ;;  %1351 = vmatprep.subr.mxu1 %v1984_v20 }
 0x1af   :  { %1436 = vmatprep.subr.mxu0 %v853_v6  ;;  %1248 = vmatprep.mubr.f32.mxu1 %v1009_v7 }
 0x1b0   :  { %1333 = vmatprep.mubr.f32.mxu0 %v1011_v8  ;;  %1249 = vmatmul.mubr.f32.gmra.mxu1 %v1008_v9 }
 0x1b1   :  { %1334 = vmatmul.mubr.f32.gmra.mxu0 %v1010_v10  ;;  %1352 = vmatpush1.xpose.msra.mxu1 %v1976_v50 }
 0x1b2   :  { %1437 = vmatpush1.xpose.msra.mxu0 %v1978_v18  ;;  %1353 = vmatprep.subr.mxu1 %v1994_v22  ;;  %v1028_v18 = vld [vmem:[%s2324_s4 + $0xe8] sm:$0xff] }
 0x1b3   :  { %1438 = vmatprep.subr.mxu0 %v1976_v50  ;;  %1253 = vmatprep.mubr.f32.mxu1 %v1018_v11  ;;  %v1026_v50 = vld [vmem:[%s2324_s4 + $0xd8] sm:$0xff] }
 0x1b4   :  { %1338 = vmatprep.mubr.f32.mxu0 %v1020_v13  ;;  %1254 = vmatmul.mubr.f32.gmra.mxu1 %v1017_v14 }
 0x1b5   :  { %1339 = vmatmul.mubr.f32.gmra.mxu0 %v1019_v15  ;;  %1354 = vmatpush1.xpose.msra.mxu1 %v1988_v47 }
 0x1b6   :  { %1439 = vmatpush1.xpose.msra.mxu0 %v1980_v19  ;;  %1355 = vmatprep.subr.mxu1 %v2004_v25  ;;  %v1004_v19 = vld [vmem:[%s2324_s4 + $0x28] sm:$0xff] }
 0x1b7   :  { %1440 = vmatprep.subr.mxu0 %v1988_v47  ;;  %1258 = vmatprep.mubr.f32.mxu1 %v1027_v16  ;;  %v942_v47 = vld [vmem:[#allocation2 + $0x91] sm:$0xff] }
 0x1b8   :  { %1343 = vmatprep.mubr.f32.mxu0 %v1029_v17  ;;  %1259 = vmatmul.mubr.f32.gmra.mxu1 %v1026_v50 }
 0x1b9   :  { %1344 = vmatmul.mubr.f32.gmra.mxu0 %v1028_v18  ;;  %1356 = vmatpush1.xpose.msra.mxu1 %v1998_v23 }
 0x1ba   :  { %1441 = vmatpush1.xpose.msra.mxu0 %v1992_v21  ;;  %1357 = vmatprep.subr.mxu1 %v2014_v28  ;;  %v2195_v21 = vld [vmem:[#allocation2 + $0x82] sm:$0xff] }
 0x1bb   :  { %1442 = vmatprep.subr.mxu0 %v1998_v23  ;;  %1413 = vmatprep.mubr.f32.mxu1 %v1004_v19  ;;  %v845_v23 = vld [vmem:[#allocation2 + $0x81] sm:$0xff] }
 0x1bc   :  { %1498 = vmatprep.mubr.f32.mxu0 %v1006_v36 }
 0x1bd   :  { %1358 = vmatpush1.xpose.msra.mxu1 %v2008_v26 }
 0x1be   :  { %1443 = vmatpush1.xpose.msra.mxu0 %v2002_v24  ;;  %1359 = vmatprep.subr.mxu1 %v2024_v31  ;;  %v1003_v24 = vld [vmem:[%s2324_s4 + $0x20] sm:$0xff] }
 0x1bf   :  { %1444 = vmatprep.subr.mxu0 %v2008_v26  ;;  %v1005_v26 = vld [vmem:[%s2324_s4 + $0x30] sm:$0xff] }
 0x1c1   :  { %1360 = vmatpush1.xpose.msra.mxu1 %v2018_v29 }
 0x1c2   :  { %1445 = vmatpush1.xpose.msra.mxu0 %v2012_v27  ;;  %1361 = vmatprep.subr.mxu1 %v2034_v34  ;;  %v1013_v27 = vld [vmem:[%s2324_s4 + $0x70] sm:$0xff] }
 0x1c3   :  { %1446 = vmatprep.subr.mxu0 %v2018_v29  ;;  %v1015_v29 = vld [vmem:[%s2324_s4 + $0x80] sm:$0xff] }
 0x1c5   :  { %1362 = vmatpush1.xpose.msra.mxu1 %v2028_v32 }
 0x1c6   :  { %1447 = vmatpush1.xpose.msra.mxu0 %v2022_v30  ;;  %1363 = vmatprep.subr.mxu1 %v2042_v38  ;;  %v1012_v30 = vld [vmem:[%s2324_s4 + $0x68] sm:$0xff]  ;;  %v1023_v38 = vld [vmem:[%s2324_s4 + $0xc0] sm:$0xff] }
 0x1c7   :  { %1448 = vmatprep.subr.mxu0 %v2028_v32  ;;  %v1014_v32 = vld [vmem:[%s2324_s4 + $0x78] sm:$0xff] }
 0x1c9   :  { %1364 = vmatpush1.xpose.msra.mxu1 %v2038_v35  ;;  %v1024_v35 = vld [vmem:[%s2324_s4 + $0xc8] sm:$0xff] }
 0x1ca   :  { %1449 = vmatpush1.xpose.msra.mxu0 %v2032_v33  ;;  %1365 = vmatprep.subr.mxu1 %v2195_v21  ;;  %v1022_v33 = vld [vmem:[%s2324_s4 + $0xb8] sm:$0xff] }
 0x1cb   :  { %1450 = vmatprep.subr.mxu0 %v942_v47 }
 0x1cd   :  { %1366 = vmatpush1.xpose.msra.mxu1 %v845_v23 }
 0x1ce   :  { %1451 = vmatpush1.xpose.msra.mxu0 %v1760_v12  ;;  %1367 = vmatprep.subr.mxu1 %v2054_v43  ;;  %v982_v12 = vld [vmem:[#allocation2 + $0x132] sm:$0xff] }
 0x1cf   :  { %1452 = vmatprep.subr.mxu0 %v845_v23 }
 0x1d1   :  { %1368 = vmatpush1.xpose.msra.mxu1 %v2046_v40 }
 0x1d2   :  { %1453 = vmatpush1.xpose.msra.mxu0 %v2048_v41  ;;  %1369 = vmatprep.subr.mxu1 %v2064_v48  ;;  %v1030_v41 = vld [vmem:[%s2324_s4 + $0xf8] sm:$0xff] }
 0x1d3   :  { %1454 = vmatprep.subr.mxu0 %v2046_v40  ;;  %v1033_v40 = vld [vmem:[%s2324_s4 + $0x110] sm:$0xff] }
 0x1d5   :  { %1370 = vmatpush1.xpose.msra.mxu1 %v2058_v44 }
 0x1d6   :  { %1455 = vmatpush1.xpose.msra.mxu0 %v2052_v42  ;;  %1371 = vmatprep.subr.mxu1 %v2074_v52  ;;  %v1032_v42 = vld [vmem:[%s2324_s4 + $0x108] sm:$0xff] }
 0x1d7   :  { %1456 = vmatprep.subr.mxu0 %v2058_v44  ;;  %v1007_v44 = vld [vmem:[%s2324_s4 + $0x40] sm:$0xff] }
 0x1d9   :  { %1372 = vmatpush1.xpose.msra.mxu1 %v2068_v49 }
 0x1da   :  { %1457 = vmatpush1.xpose.msra.mxu0 %v2062_v46  ;;  %1373 = vmatprep.subr.mxu1 %v2084_v55 }
 0x1db   :  { %1458 = vmatprep.subr.mxu0 %v2068_v49 }
 0x1dd   :  { %1374 = vmatpush1.xpose.msra.mxu1 %v2078_v53 }
 0x1de   :  { %1459 = vmatpush1.xpose.msra.mxu0 %v2072_v51  ;;  %1375 = vmatprep.subr.mxu1 %v2094_v59 }
 0x1df   :  { %1460 = vmatprep.subr.mxu0 %v2078_v53 }
 0x1e1   :  { %1376 = vmatpush1.xpose.msra.mxu1 %v2088_v56 }
 0x1e2   :  { %1461 = vmatpush1.xpose.msra.mxu0 %v2082_v54  ;;  %1377 = vmatprep.subr.mxu1 %v2104_v62 }
 0x1e3   :  { %1462 = vmatprep.subr.mxu0 %v2088_v56 }
 0x1e5   :  { %1378 = vmatpush1.xpose.msra.mxu1 %v2098_v60 }
 0x1e6   :  { %1463 = vmatpush1.xpose.msra.mxu0 %v2092_v57  ;;  %1379 = vmatprep.subr.mxu1 %v2112_v2 }
 0x1e7   :  { %1464 = vmatprep.subr.mxu0 %v2098_v60 }
 0x1e9   :  { %1380 = vmatpush1.xpose.msra.mxu1 %v2108_v45 }
 0x1ea   :  { %1465 = vmatpush1.xpose.msra.mxu0 %v2102_v61  ;;  %1700 = vmatprep.subr.mxu1 %v982_v12 }
 0x1ec   :  { %1414 = vmatmul.mubr.f32.vlgmr.msra.gmra.mxu1 %v1003_v24 }
 0x1ed   :  { %1499 = vmatmul.mubr.f32.vlgmr.msra.gmra.mxu0 %v1005_v26  ;;  %1701 = vmatpush3.xpose.msra.mxu1 %v982_v12 }
 0x1ee   :  { %1418 = vmatprep.mubr.f32.mxu1 %v1013_v27  ;;  %1702 = vmatprep.subr.mxu1 %v2116_v5 }
 0x1ef   :  { %1503 = vmatprep.mubr.f32.mxu0 %v1015_v29 }
 0x1f0   :  { %1419 = vmatmul.mubr.f32.gmra.mxu1 %v1012_v30 }
 0x1f1   :  { %1504 = vmatmul.mubr.f32.gmra.mxu0 %v1014_v32  ;;  %1703 = vmatpush3.xpose.msra.mxu1 %v2116_v5 }
 0x1f2   :  { %1423 = vmatprep.mubr.f32.mxu1 %v1022_v33  ;;  %1704 = vmatprep.subr.mxu1 %v1984_v20 }
 0x1f3   :  { %1508 = vmatprep.mubr.f32.mxu0 %v1024_v35 }
 0x1f4   :  { %1424 = vmatmul.mubr.f32.gmra.mxu1 %v1021_v37 }
 0x1f5   :  { %1509 = vmatmul.mubr.f32.gmra.mxu0 %v1023_v38  ;;  %1705 = vmatpush3.xpose.msra.mxu1 %v1984_v20  ;;  %v974_v20 = vld [vmem:[#allocation2 + $0x92] sm:$0xff] }
 0x1f6   :  { %1428 = vmatprep.mubr.f32.mxu1 %v1031_v39  ;;  %1706 = vmatprep.subr.mxu1 %v1994_v22 }
 0x1f7   :  { %1513 = vmatprep.mubr.f32.mxu0 %v1033_v40 }
 0x1f8   :  { %1429 = vmatmul.mubr.f32.gmra.mxu1 %v1030_v41 }
 0x1f9   :  { %1514 = vmatmul.mubr.f32.gmra.mxu0 %v1032_v42  ;;  %1707 = vmatpush3.xpose.msra.mxu1 %v1994_v22  ;;  %v1016_v22 = vld [vmem:[%s2324_s4 + $0x88] sm:$0xff] }
 0x1fa   :  { %1732 = vmatprep.mubr.f32.mxu1 %v1007_v44  ;;  %1708 = vmatprep.subr.mxu1 %v2004_v25 }
 0x1fd   :  { %1709 = vmatpush3.xpose.msra.mxu1 %v2004_v25  ;;  %v1025_v25 = vld [vmem:[%s2324_s4 + $0xd0] sm:$0xff] }
 0x1fe   :  { %1710 = vmatprep.subr.mxu1 %v2014_v28 }
 0x201   :  { %1711 = vmatpush3.xpose.msra.mxu1 %v2014_v28  ;;  %v1034_v28 = vld [vmem:[%s2324_s4 + $0x118] sm:$0xff] }
 0x202   :  { %1712 = vmatprep.subr.mxu1 %v2024_v31 }
 0x205   :  { %1713 = vmatpush3.xpose.msra.mxu1 %v2024_v31 }
 0x206   :  { %1714 = vmatprep.subr.mxu1 %v2034_v34 }
 0x209   :  { %1715 = vmatpush3.xpose.msra.mxu1 %v2034_v34 }
 0x20a   :  { %1716 = vmatprep.subr.mxu1 %v974_v20 }
 0x20d   :  { %1717 = vmatpush3.xpose.msra.mxu1 %v974_v20 }
 0x20e   :  { %1718 = vmatprep.subr.mxu1 %v2195_v21 }
 0x211   :  { %1719 = vmatpush3.xpose.msra.mxu1 %v2195_v21 }
 0x212   :  { %1720 = vmatprep.subr.mxu1 %v2054_v43 }
 0x215   :  { %1721 = vmatpush3.xpose.msra.mxu1 %v2054_v43 }
 0x216   :  { %1722 = vmatprep.subr.mxu1 %v2064_v48 }
 0x219   :  { %1723 = vmatpush3.xpose.msra.mxu1 %v2064_v48 }
 0x21a   :  { %1724 = vmatprep.subr.mxu1 %v2074_v52 }
 0x21d   :  { %1725 = vmatpush3.xpose.msra.mxu1 %v2074_v52 }
 0x21e   :  { %1726 = vmatprep.subr.mxu1 %v2084_v55 }
 0x221   :  { %1727 = vmatpush3.xpose.msra.mxu1 %v2084_v55 }
 0x222   :  { %1728 = vmatprep.subr.mxu1 %v2094_v59 }
 0x225   :  { %1729 = vmatpush3.xpose.msra.mxu1 %v2094_v59 }
 0x226   :  { %1730 = vmatprep.subr.mxu1 %v2104_v62 }
 0x229   :  { %1731 = vmatpush3.xpose.msra.mxu1 %v2104_v62 }
 0x22c   :  { %1733 = vmatmul.mubr.f32.vlgmr.msra.gmra.mxu1 %v1016_v22 }
 0x22d   :  { %1735 = vmatprep.mubr.f32.mxu1 %v1025_v25 }
 0x230   :  { %1736 = vmatmul.mubr.f32.gmra.mxu1 %v1034_v28 }
 0x26c   :  { %v1245_v31 = vpop.f32.mrf.mxu1 }
 0x26d   :  { %v1330_v34 = vpop.f32.mrf.mxu0 }
 0x26e   :  { %v1331_v43 = vadd.f32 %v1330_v34, %v1245_v31  ;;  %v1247_v46 = vpop.f32.mrf.mxu1 }
 0x26f   :  { %v1332_v48 = vpop.f32.mrf.mxu0 }
 0x270   :  { %v1250_v49 = vpop.f32.mrf.mxu1 }
 0x271   :  { %v1335_v51 = vpop.f32.mrf.mxu0 }
 0x272   :  { %v1336_v52 = vadd.f32 %v1335_v51, %v1250_v49  ;;  %v1252_v53 = vpop.f32.mrf.mxu1 }
 0x273   :  { %v1337_v54 = vpop.f32.mrf.mxu0 }
 0x274   :  { %v1255_v55 = vpop.f32.mrf.mxu1 }
 0x275   :  { %v1340_v56 = vpop.f32.mrf.mxu0 }
 0x276   :  { %v1341_v57 = vadd.f32 %v1340_v56, %v1255_v55  ;;  %v1257_v59 = vpop.f32.mrf.mxu1 }
 0x277   :  { %v1342_v60 = vpop.f32.mrf.mxu0 }
 0x278   :  { %v1260_v61 = vpop.f32.mrf.mxu1 }
 0x279   :  { %v1345_v62 = vpop.f32.mrf.mxu0 }
 0x27a   :  { %v1346_v45 = vadd.f32 %v1345_v62, %v1260_v61  ;;  %v1262_v63 = vpop.f32.mrf.mxu1 }
 0x27b   :  { %v1347_v0 = vpop.f32.mrf.mxu0 }
 0x2ac   :  { %v1415_v2 = vpop.f32.mrf.mxu1 }
 0x2ad   :  { %v1500_v3 = vpop.f32.mrf.mxu0  ;;  %v1416_v4 = vadd.f32 %v1415_v2, %v1331_v43 }
 0x2ae   :  { %v1417_v5 = vpop.f32.mrf.mxu1 }
 0x2af   :  { %v1502_v58 = vpop.f32.mrf.mxu0  ;;  %v1501_v1 = vadd.f32 %v1500_v3, %v1416_v4 }
 0x2b0   :  { %v1420_v6 = vpop.f32.mrf.mxu1 }
 0x2b1   :  { %v1505_v7 = vpop.f32.mrf.mxu0  ;;  %v1421_v18 = vadd.f32 %v1420_v6, %v1336_v52 }
 0x2b2   :  { %v1422_v8 = vpop.f32.mrf.mxu1 }
 0x2b3   :  { %v1507_v9 = vpop.f32.mrf.mxu0  ;;  %v1506_v19 = vadd.f32 %v1505_v7, %v1421_v18 }
 0x2b4   :  { %v1425_v10 = vpop.f32.mrf.mxu1 }
 0x2b5   :  { %v1510_v11 = vpop.f32.mrf.mxu0  ;;  %v1426_v21 = vadd.f32 %v1425_v10, %v1341_v57 }
 0x2b6   :  { %v1427_v13 = vpop.f32.mrf.mxu1 }
 0x2b7   :  { %v1512_v14 = vpop.f32.mrf.mxu0  ;;  %v1511_v30 = vadd.f32 %v1510_v11, %v1426_v21 }
 0x2b8   :  { %v1430_v15 = vpop.f32.mrf.mxu1 }
 0x2b9   :  { %v1515_v16 = vpop.f32.mrf.mxu0  ;;  %v1431_v36 = vadd.f32 %v1430_v15, %v1346_v45 }
 0x2ba   :  { %v1432_v17 = vpop.f32.mrf.mxu1 }
 0x2bb   :  { %v1517_v50 = vpop.f32.mrf.mxu0  ;;  %v1516_v24 = vadd.f32 %v1515_v16, %v1431_v36 }
 0x2ec   :  { %v1734_v47 = vpop.f32.mrf.mxu1 }
 0x2ed   :  { %v1591_v23 = vadd.f32 %v1734_v47, %v1506_v19 }
 0x2ee   :  { %v1585_v12 = vpop.f32.mrf.mxu1 }
 0x2ef   :  { %v1643_v26 = vmul.f32 -1.442695, %v1591_v23  ;;  %v1586_v27 = vadd.f32 %v1585_v12, %v1501_v1 }
 0x2f0   :  { %v1737_v29 = vpop.f32.mrf.mxu1 }
 0x2f1   :  { %1744 = vpow2.f32 %v1643_v26  ;;  %v1642_v32 = vmul.f32 -1.442695, %v1586_v27  ;;  %v1601_v33 = vadd.f32 %v1737_v29, %v1516_v24 }
 0x2f2   :  { %v1595_v35 = vpop.f32.mrf.mxu1 }
 0x2f3   :  { %1746 = vpow2.f32 %v1642_v32  ;;  %v1645_v37 = vmul.f32 -1.442695, %v1601_v33  ;;  %v1596_v38 = vadd.f32 %v1595_v35, %v1511_v30 }
 0x2f5   :  { %1748 = vpow2.f32 %v1645_v37  ;;  %v1644_v39 = vmul.f32 -1.442695, %v1596_v38 }
 0x2f7   :  { %1750 = vpow2.f32 %v1644_v39 }
 0x2fe   :  { %v1745_v40 = vpop.eup %1744 }
 0x2ff   :  { %v1617_v41 = vadd.f32 1.0, %v1745_v40 }
 0x300   :  { %v1747_v42 = vpop.eup %1746 }
 0x301   :  { %1752 = vrcp.f32 %v1617_v41  ;;  %v1616_v44 = vadd.f32 1.0, %v1747_v42 }
 0x302   :  { %v1749_v20 = vpop.eup %1748 }
 0x303   :  { %1754 = vrcp.f32 %v1616_v44  ;;  %v1619_v22 = vadd.f32 1.0, %v1749_v20 }
 0x304   :  { %v1751_v25 = vpop.eup %1750 }
 0x305   :  { %1756 = vrcp.f32 %v1619_v22  ;;  %v1618_v28 = vadd.f32 1.0, %v1751_v25 }
 0x307   :  { %1758 = vrcp.f32 %v1618_v28 }
 0x30e   :  { %v1753_v31 = vpop.eup %1752 }
 0x30f   :  { %1629 = vst [vmem:[%s2325_s5 + $0x8] sm:$0xff] %v1753_v31 }
 0x310   :  { %v1755_v34 = vpop.eup %1754 }
 0x311   :  { %1628 = vst [vmem:[%s2325_s5] sm:$0xff] %v1755_v34 }
 0x312   :  { %v1757_v43 = vpop.eup %1756 }
 0x313   :  { %1631 = vst [vmem:[%s2325_s5 + $0x18] sm:$0xff] %v1757_v43 }
 0x314   :  { %v1759_v46 = vpop.eup %1758 }
 0x315   :  { %1630 = vst [vmem:[%s2325_s5 + $0x10] sm:$0xff] %v1759_v46 }

</bundles_post_ra>
